<compile_context>
chip_gen: v7x
topology: tpu7x:2x2x1
jax: 0.10.0
libtpu: 0.0.40
codegen_flags: <defaults>
</compile_context>

<pallas_src>
import functools

import jax
import jax.numpy as jnp
from jax.experimental import pallas as pl
from jax.experimental.pallas import tpu as pltpu


# ----------------------------------------------------------------------------
# Kernel
# ----------------------------------------------------------------------------
def _coupling_kernel(x_ref, *refs):
    """out = x + MLP(x).  All mask / sign handling is pre-folded into weights."""
    out_ref = refs[-1]
    param_refs = refs[:-1]
    n_layers = len(param_refs) // 2

    x = x_ref[...]                                 # (tile_rows, lane_dim) f32
    h = x
    for layer in range(n_layers):
        w = param_refs[2 * layer][...]             # (d_in, d_out)  f32 or bf16
        b = param_refs[2 * layer + 1][...]         # (1, d_out)     f32
        h = jnp.dot(h.astype(w.dtype), w,
                    preferred_element_type=jnp.float32) + b
        if layer < n_layers - 1:
            h = jnp.maximum(h, 0.1 * h)            # LeakyReLU(0.1), single VALU op
    out_ref[...] = (x + h).astype(out_ref.dtype)


# ----------------------------------------------------------------------------
# Wrapper helpers
# ----------------------------------------------------------------------------
def _device_kind():
    try:
        return jax.devices()[0].device_kind.lower()
    except Exception:
        return ""


def _vmem_capacity_bytes():
    try:
        return int(pltpu.get_tpu_info().vmem_capacity_bytes)
    except Exception:
        return 64 << 20            # conservative: assume v7x (64 MiB per core)


def _choose_tile_rows(rows, row_bytes, budget_bytes, min_grid_steps=4):
    """Largest multiple-of-8 row tile within the byte budget, aiming for at
    least `min_grid_steps` grid steps (keeps v7x's two TensorCores balanced
    and pipelined).  The grid uses cdiv; Pallas masks the ragged last block."""
    if rows <= 8:
        return rows
    cap = max(8, (budget_bytes // max(row_bytes, 1)) // 8 * 8)
    tile = rows if cap >= rows else cap
    target_steps = min(min_grid_steps, rows // 8)
    if target_steps >= 2:
        target = max(8, ((pl.cdiv(rows, target_steps) + 7) // 8) * 8)
        tile = min(tile, target)
    return tile


def _param_index_map(i):           # grid-invariant operands
    return (0, 0)


# ----------------------------------------------------------------------------
# Wrapper
# ----------------------------------------------------------------------------
def additive_coupling_forward(x, log_det_J, mask, params, *,
                              reverse=False,
                              use_bf16_matmul=None,
                              lane_width=None,
                              max_block_bytes=4 << 20,
                              enable_buffer_hints=True,
                              alias_io=True):
    """Pallas-backed AdditiveCoupling forward/inverse pass.

    Args:
      x:          (B, D) float32 input.
      log_det_J:  scalar, passed through unchanged (unit Jacobian determinant).
      mask:       (1, D) or (D,) binary 0/1 float mask.
      params:     flat list [W0, b0, ..., W_last, b_last]; W_i stored as
                  (in, out) (PyTorch weight transposed), b_i as (out,)/(1,out).
      reverse:    False -> sampling direction (add m(x1)); True -> inference
                  direction (subtract m(y1)), exactly as in the nn.Module.
      use_bf16_matmul: None = auto (True on v5*, False elsewhere).  Casts
                  weights/activations to bf16 for the MXU with f32 accumulation.
      lane_width: None = auto (256 on v6e with bf16, else 128) lane packing.
      max_block_bytes: per-tile byte budget for the x / out batch tiles.
      enable_buffer_hints: use per-BlockSpec pipeline_mode (single-buffered
                  params, 3-deep x pipeline when VMEM allows).
      alias_io:   alias the output HBM buffer onto the input.
    Returns:
      (out, log_det_J) with out of shape (B, D).
    """
    B, D = x.shape
    dtype = x.dtype
    itemsize = dtype.itemsize
    mask = jnp.asarray(mask, dtype).reshape(1, D)
    omask = 1.0 - mask

    kind = _device_kind()
    vmem_cap = _vmem_capacity_bytes()
    vmem_ceiling = max((vmem_cap * 3) // 4, 32 << 20)   # ~96 MiB v5e/v6e, ~48 MiB v7x

    if use_bf16_matmul is None:
        # The kron fold inflates MXU FLOPs by 128/D; f32 on v5e goes MXU-bound.
        use_bf16_matmul = "v5" in kind
    if lane_width is None:
        # v6e's 2x256x256 MXU natively matches 256-wide packed rows (still
        # HBM-bound in bf16); keep 128 lanes on v5e / v7x.
        lane_width = 256 if (use_bf16_matmul and "v6" in kind) else 128

    n_layers = len(params) // 2
    ws = [jnp.asarray(params[2 * i]) for i in range(n_layers)]
    bs = [jnp.asarray(params[2 * i + 1]).reshape(1, -1) for i in range(n_layers)]

    # Fold the mask (and reverse sign) into the first / last Linear.  Exact
    # for a binary mask:
    #   (mask*x) @ W0            == x @ (mask.T * W0)
    #   (h @ Wl + bl) * (1-mask) == h @ (Wl*(1-mask)) + bl*(1-mask)
    ws[0] = ws[0] * mask.reshape(D, 1)
    ws[-1] = ws[-1] * omask
    bs[-1] = bs[-1] * omask
    if reverse:
        ws[-1] = -ws[-1]
        bs[-1] = -bs[-1]
    if use_bf16_matmul:
        ws = [w.astype(jnp.bfloat16) for w in ws]

    # Lane-dense folding: pack k batch rows per lane row (weights -> kron(I_k,W)).
    fold = 1
    for lw in sorted({int(lane_width), 128}, reverse=True):
        if D < lw and lw % D == 0:
            k = lw // D
            kron_bytes = sum(int(w.size) * w.dtype.itemsize * k * k for w in ws)
            kron_bytes += sum(int(b.size) * b.dtype.itemsize * k for b in bs)
            if B % k == 0 and kron_bytes <= vmem_cap // 8:
                fold = k
                break
    if fold > 1:
        eye = jnp.eye(fold, dtype=ws[0].dtype)
        ws = [jnp.kron(eye, w) for w in ws]            # block-diagonal weights
        bs = [jnp.tile(b, (1, fold)) for b in bs]
        xk = x.reshape(B // fold, fold * D)            # free row-major reshape
    else:
        xk = x

    rows, cols = xk.shape
    flat_params = []
    for w, b in zip(ws, bs):
        flat_params += [w, b]
    param_bytes = sum(int(p.size) * p.dtype.itemsize for p in flat_params)
    param_bufs = 1 if enable_buffer_hints else 2
    act_width = max(int(w.shape[1]) for w in ws)       # widest (folded) activation

    # Pick the row tile: start from the budget; shrink if the VMEM footprint
    # (x 2-3 bufs, out 2 bufs, params, f32 activation temporaries + cast
    # copies, headroom) would exceed this chip's ceiling.
    budget = int(max_block_bytes)
    while True:
        tile = _choose_tile_rows(rows, cols * itemsize, budget)
        steps = pl.cdiv(rows, tile)
        tile_bytes = tile * cols * itemsize
        act_bytes = 3 * tile * act_width * 4           # f32 h + dtype-cast copies
        base_est = 2 * tile_bytes + param_bufs * param_bytes + act_bytes + (2 << 20)
        deep_x = (enable_buffer_hints and steps >= 4
                  and base_est + 3 * tile_bytes <= vmem_ceiling)
        x_bufs = 3 if deep_x else 2
        vmem_est = base_est + x_bufs * tile_bytes
        if vmem_est <= vmem_ceiling or budget <= (256 << 10):
            break
        budget //= 2
    grid = (pl.cdiv(rows, tile),)
    vmem_limit = int(min(max(vmem_est, 16 << 20), vmem_ceiling))

    if deep_x:
        x_spec = pl.BlockSpec((tile, cols), lambda i: (i, 0),
                              pipeline_mode=pl.Buffered(3))
    else:
        x_spec = pl.BlockSpec((tile, cols), lambda i: (i, 0))
    in_specs = [x_spec]
    for p in flat_params:
        if enable_buffer_hints:
            # Grid-invariant: DMA'd once; the default second buffer is wasted VMEM.
            in_specs.append(pl.BlockSpec(p.shape, _param_index_map,
                                         pipeline_mode=pl.Buffered(1)))
        else:
            in_specs.append(pl.BlockSpec(p.shape, _param_index_map))
    out_specs = pl.BlockSpec((tile, cols), lambda i: (i, 0))

    out = pl.pallas_call(
        _coupling_kernel,
        out_shape=jax.ShapeDtypeStruct((rows, cols), dtype),
        grid=grid,
        in_specs=in_specs,
        out_specs=out_specs,
        # Output tile i == input tile i, so writeback never clobbers an unread
        # region; aliasing saves a rows*cols*4B HBM allocation + copy.
        input_output_aliases={0: 0} if alias_io else {},
        compiler_params=pltpu.CompilerParams(
            dimension_semantics=("parallel",),
            vmem_limit_bytes=vmem_limit),
    )(xk, *flat_params)

    return out.reshape(B, D), log_det_J


# ----------------------------------------------------------------------------
# Parameter / mask helpers and plain-JAX reference
# ----------------------------------------------------------------------------
def init_params(key, in_out_dim, mid_dim, hidden):
    """PyTorch-style uniform Linear init; weights stored as (in, out)."""
    dims = [in_out_dim, mid_dim] + [mid_dim] * hidden + [in_out_dim]
    params = []
    for i in range(len(dims) - 1):
        d_in, d_out = dims[i], dims[i + 1]
        key, kw, kb = jax.random.split(key, 3)
        bound = 1.0 / jnp.sqrt(d_in)
        w = jax.random.uniform(kw, (d_in, d_out), jnp.float32, -bound, bound)
        b = jax.random.uniform(kb, (1, d_out), jnp.float32, -bound, bound)
        params += [w, b]
    return params


def make_mask(in_out_dim, mask_config):
    # mask_config == 0: even indices -> 1; mask_config == 1: odd indices -> 1
    idx = jnp.arange(in_out_dim)
    mask = jnp.where(idx % 2 == 0, 1.0 - mask_config, float(mask_config))
    return mask.astype(jnp.float32).reshape(1, in_out_dim)


def reference_forward(x, log_det_J, mask, params, reverse=False):
    """Plain-JAX mirror of the PyTorch module (for correctness checking)."""
    n_layers = len(params) // 2

    def m(h):
        for layer in range(n_layers):
            w = params[2 * layer]
            b = params[2 * layer + 1].reshape(1, -1)
            h = h @ w + b
            if layer < n_layers - 1:
                h = jnp.where(h > 0, h, 0.1 * h)   # LeakyReLU(0.1)
        return h

    x1, x2 = mask * x, (1.0 - mask) * x
    if not reverse:
        y2 = x2 + m(x1) * (1.0 - mask)
    else:
        y2 = x2 - m(x1) * (1.0 - mask)
    return x1 + y2, log_det_J


def _call_with_fallbacks(*args, **kwargs):
    """jit + run the wrapper; if this jax/libtpu build rejects an optional
    feature (per-BlockSpec pipeline_mode, I/O aliasing), retry without it."""
    attempts = (
        {},
        {"enable_buffer_hints": False},
        {"enable_buffer_hints": False, "alias_io": False},
    )
    last_err = None
    for extra in attempts:
        try:
            fn = jax.jit(functools.partial(additive_coupling_forward,
                                           **{**kwargs, **extra}))
            return jax.block_until_ready(fn(*args))
        except Exception as err:           # version-dependent feature support
            last_err = err
    raise last_err


# ----------------------------------------------------------------------------
# Self-test
# ----------------------------------------------------------------------------
if __name__ == "__main__":
    key = jax.random.PRNGKey(0)
    kx, kp, kx2 = jax.random.split(key, 3)

    # Small config consistent with the module.
    batch, in_out_dim, mid_dim, hidden, mask_config = 128, 16, 32, 1, 0

    x = jax.random.normal(kx, (batch, in_out_dim), jnp.float32)
    log_det_J = jnp.float32(0.0)
    mask = make_mask(in_out_dim, mask_config)
    params = init_params(kp, in_out_dim, mid_dim, hidden)

    # --- exact f32 path: forward, inverse, round trip -----------------------
    out, ldj = _call_with_fallbacks(x, log_det_J, mask, params,
                                    reverse=False, use_bf16_matmul=False)
    ref_out, ref_ldj = reference_forward(x, log_det_J, mask, params)
    assert jnp.allclose(out, ref_out, atol=1e-5, rtol=1e-5), "forward mismatch"
    assert jnp.allclose(ldj, ref_ldj), "log_det_J must pass through unchanged"

    back, _ = _call_with_fallbacks(out, log_det_J, mask, params,
                                   reverse=True, use_bf16_matmul=False)
    ref_back, _ = reference_forward(out, log_det_J, mask, params, reverse=True)
    assert jnp.allclose(back, ref_back, atol=1e-5, rtol=1e-5), "reverse mismatch"
    assert jnp.allclose(back, x, atol=1e-4, rtol=1e-4), "round-trip mismatch"

    # --- ragged batch (cdiv grid + masked last block), mask_config = 1 ------
    xr = jax.random.normal(kx2, (100, in_out_dim), jnp.float32)
    mask1 = make_mask(in_out_dim, 1)
    out_r, _ = _call_with_fallbacks(xr, log_det_J, mask1, params,
                                    reverse=False, use_bf16_matmul=False)
    ref_r, _ = reference_forward(xr, log_det_J, mask1, params)
    assert jnp.allclose(out_r, ref_r, atol=1e-5, rtol=1e-5), "ragged mismatch"

    # --- bf16 MXU path (default on v5e): looser fwd tol, tight round trip ---
    out_bf, _ = _call_with_fallbacks(x, log_det_J, mask, params,
                                     reverse=False, use_bf16_matmul=True)
    assert jnp.allclose(out_bf, ref_out, atol=5e-2, rtol=5e-2), "bf16 fwd mismatch"
    back_bf, _ = _call_with_fallbacks(out_bf, log_det_J, mask, params,
                                      reverse=True, use_bf16_matmul=True)
    assert jnp.allclose(back_bf, x, atol=1e-4, rtol=1e-4), "bf16 round-trip"

    print("KERNEL_OK")
</pallas_src>

<mosaic_0001>
module attributes {stable_mosaic.version = 11 : i64} {
  func.func @_coupling_kernel(%arg0: i32, %arg1: memref<8x128xf32, #tpu.memory_space<vmem>>, %arg2: memref<128x256xf32, #tpu.memory_space<vmem>>, %arg3: memref<1x256xf32, #tpu.memory_space<vmem>>, %arg4: memref<256x256xf32, #tpu.memory_space<vmem>>, %arg5: memref<1x256xf32, #tpu.memory_space<vmem>>, %arg6: memref<256x128xf32, #tpu.memory_space<vmem>>, %arg7: memref<1x128xf32, #tpu.memory_space<vmem>>, %arg8: memref<8x128xf32, #tpu.memory_space<vmem>>) attributes {dimension_semantics = [#tpu.dimension_semantics<parallel>], iteration_bounds = array<i64: 2>, scalar_prefetch = 0 : i64, scratch_operands = 0 : i64, tpu.core_type = #tpu.core_type<tc>, window_params = [{transform_indices = @transform_0, window_bounds = array<i64: 8, 128>}, {pipeline_mode = #tpu.pipeline_mode<synchronous>, transform_indices = @transform_1, window_bounds = array<i64: 128, 256>}, {pipeline_mode = #tpu.pipeline_mode<synchronous>, transform_indices = @transform_2, window_bounds = array<i64: 1, 256>}, {pipeline_mode = #tpu.pipeline_mode<synchronous>, transform_indices = @transform_3, window_bounds = array<i64: 256, 256>}, {pipeline_mode = #tpu.pipeline_mode<synchronous>, transform_indices = @transform_4, window_bounds = array<i64: 1, 256>}, {pipeline_mode = #tpu.pipeline_mode<synchronous>, transform_indices = @transform_5, window_bounds = array<i64: 256, 128>}, {pipeline_mode = #tpu.pipeline_mode<synchronous>, transform_indices = @transform_6, window_bounds = array<i64: 1, 128>}, {transform_indices = @transform_7, window_bounds = array<i64: 8, 128>}]} {
    %c0 = arith.constant 0 : index
    %c0_0 = arith.constant 0 : index
    %0 = vector.load %arg1[%c0, %c0_0] : memref<8x128xf32, #tpu.memory_space<vmem>>, vector<8x128xf32>
    %c0_1 = arith.constant 0 : index
    %c0_2 = arith.constant 0 : index
    %1 = vector.load %arg2[%c0_1, %c0_2] : memref<128x256xf32, #tpu.memory_space<vmem>>, vector<128x256xf32>
    %c0_3 = arith.constant 0 : index
    %c0_4 = arith.constant 0 : index
    %2 = vector.load %arg3[%c0_3, %c0_4] : memref<1x256xf32, #tpu.memory_space<vmem>>, vector<1x256xf32>
    %cst = arith.constant dense<0.000000e+00> : vector<8x256xf32>
    %3 = tpu.matmul %0, %1, %cst {dimension_numbers = #tpu.dot_dimension_numbers<[1], [0], [0], [1], [0, 0, 1, 1], [], []>} : vector<8x128xf32>, vector<128x256xf32>, vector<8x256xf32> -> vector<8x256xf32>
    %4 = vector.broadcast %2 : vector<1x256xf32> to vector<8x256xf32>
    %5 = arith.addf %3, %4 : vector<8x256xf32>
    %cst_5 = arith.constant 1.000000e-01 : f32
    %6 = vector.broadcast %cst_5 : f32 to vector<8x256xf32>
    %7 = arith.mulf %6, %5 : vector<8x256xf32>
    %8 = arith.maximumf %5, %7 : vector<8x256xf32>
    %c0_6 = arith.constant 0 : index
    %c0_7 = arith.constant 0 : index
    %9 = vector.load %arg4[%c0_6, %c0_7] : memref<256x256xf32, #tpu.memory_space<vmem>>, vector<256x256xf32>
    %c0_8 = arith.constant 0 : index
    %c0_9 = arith.constant 0 : index
    %10 = vector.load %arg5[%c0_8, %c0_9] : memref<1x256xf32, #tpu.memory_space<vmem>>, vector<1x256xf32>
    %cst_10 = arith.constant dense<0.000000e+00> : vector<8x256xf32>
    %11 = tpu.matmul %8, %9, %cst_10 {dimension_numbers = #tpu.dot_dimension_numbers<[1], [0], [0], [1], [0, 0, 1, 1], [], []>} : vector<8x256xf32>, vector<256x256xf32>, vector<8x256xf32> -> vector<8x256xf32>
    %12 = vector.broadcast %10 : vector<1x256xf32> to vector<8x256xf32>
    %13 = arith.addf %11, %12 : vector<8x256xf32>
    %cst_11 = arith.constant 1.000000e-01 : f32
    %14 = vector.broadcast %cst_11 : f32 to vector<8x256xf32>
    %15 = arith.mulf %14, %13 : vector<8x256xf32>
    %16 = arith.maximumf %13, %15 : vector<8x256xf32>
    %c0_12 = arith.constant 0 : index
    %c0_13 = arith.constant 0 : index
    %17 = vector.load %arg6[%c0_12, %c0_13] : memref<256x128xf32, #tpu.memory_space<vmem>>, vector<256x128xf32>
    %c0_14 = arith.constant 0 : index
    %c0_15 = arith.constant 0 : index
    %18 = vector.load %arg7[%c0_14, %c0_15] : memref<1x128xf32, #tpu.memory_space<vmem>>, vector<1x128xf32>
    %cst_16 = arith.constant dense<0.000000e+00> : vector<8x128xf32>
    %19 = tpu.matmul %16, %17, %cst_16 {dimension_numbers = #tpu.dot_dimension_numbers<[1], [0], [0], [1], [0, 0, 1, 1], [], []>} : vector<8x256xf32>, vector<256x128xf32>, vector<8x128xf32> -> vector<8x128xf32>
    %20 = vector.broadcast %18 : vector<1x128xf32> to vector<8x128xf32>
    %21 = arith.addf %19, %20 : vector<8x128xf32>
    %22 = arith.addf %0, %21 : vector<8x128xf32>
    %c0_17 = arith.constant 0 : index
    %c0_18 = arith.constant 0 : index
    %23 = vector.load %arg8[%c0_17, %c0_18] : memref<8x128xf32, #tpu.memory_space<vmem>>, vector<8x128xf32>
    tpu.vector_store %arg8[%c0_17, %c0_18], %22 {strides = array<i32>} : memref<8x128xf32, #tpu.memory_space<vmem>>, vector<8x128xf32>,
    return
  }
  func.func @transform_0(%arg0: i32) -> (i32, i32) {
    %c0_i32 = arith.constant 0 : i32
    %c0_i32_0 = arith.constant 0 : i32
    return %arg0, %c0_i32 : i32, i32
  }
  func.func @transform_1(%arg0: i32) -> (i32, i32) {
    %c0_i32 = arith.constant 0 : i32
    %c0_i32_0 = arith.constant 0 : i32
    %c0_i32_1 = arith.constant 0 : i32
    return %c0_i32, %c0_i32_0 : i32, i32
  }
  func.func @transform_2(%arg0: i32) -> (i32, i32) {
    %c0_i32 = arith.constant 0 : i32
    %c0_i32_0 = arith.constant 0 : i32
    %c0_i32_1 = arith.constant 0 : i32
    return %c0_i32, %c0_i32_0 : i32, i32
  }
  func.func @transform_3(%arg0: i32) -> (i32, i32) {
    %c0_i32 = arith.constant 0 : i32
    %c0_i32_0 = arith.constant 0 : i32
    %c0_i32_1 = arith.constant 0 : i32
    return %c0_i32, %c0_i32_0 : i32, i32
  }
  func.func @transform_4(%arg0: i32) -> (i32, i32) {
    %c0_i32 = arith.constant 0 : i32
    %c0_i32_0 = arith.constant 0 : i32
    %c0_i32_1 = arith.constant 0 : i32
    return %c0_i32, %c0_i32_0 : i32, i32
  }
  func.func @transform_5(%arg0: i32) -> (i32, i32) {
    %c0_i32 = arith.constant 0 : i32
    %c0_i32_0 = arith.constant 0 : i32
    %c0_i32_1 = arith.constant 0 : i32
    return %c0_i32, %c0_i32_0 : i32, i32
  }
  func.func @transform_6(%arg0: i32) -> (i32, i32) {
    %c0_i32 = arith.constant 0 : i32
    %c0_i32_0 = arith.constant 0 : i32
    %c0_i32_1 = arith.constant 0 : i32
    return %c0_i32, %c0_i32_0 : i32, i32
  }
  func.func @transform_7(%arg0: i32) -> (i32, i32) {
    %c0_i32 = arith.constant 0 : i32
    %c0_i32_0 = arith.constant 0 : i32
    return %arg0, %c0_i32 : i32, i32
  }
}

module attributes {stable_mosaic.version = 11 : i64} {
  func.func @_coupling_kernel(%arg0: i32, %arg1: memref<8x128xf32, #tpu.memory_space<vmem>>, %arg2: memref<128x256xf32, #tpu.memory_space<vmem>>, %arg3: memref<1x256xf32, #tpu.memory_space<vmem>>, %arg4: memref<256x256xf32, #tpu.memory_space<vmem>>, %arg5: memref<1x256xf32, #tpu.memory_space<vmem>>, %arg6: memref<256x128xf32, #tpu.memory_space<vmem>>, %arg7: memref<1x128xf32, #tpu.memory_space<vmem>>, %arg8: memref<8x128xf32, #tpu.memory_space<vmem>>) attributes {dimension_semantics = [#tpu.dimension_semantics<parallel>], iteration_bounds = array<i64: 2>, scalar_prefetch = 0 : i64, scratch_operands = 0 : i64, tpu.core_type = #tpu.core_type<tc>, window_params = [{transform_indices = @transform_0, window_bounds = array<i64: 8, 128>}, {pipeline_mode = #tpu.pipeline_mode<synchronous>, transform_indices = @transform_1, window_bounds = array<i64: 128, 256>}, {pipeline_mode = #tpu.pipeline_mode<synchronous>, transform_indices = @transform_2, window_bounds = array<i64: 1, 256>}, {pipeline_mode = #tpu.pipeline_mode<synchronous>, transform_indices = @transform_3, window_bounds = array<i64: 256, 256>}, {pipeline_mode = #tpu.pipeline_mode<synchronous>, transform_indices = @transform_4, window_bounds = array<i64: 1, 256>}, {pipeline_mode = #tpu.pipeline_mode<synchronous>, transform_indices = @transform_5, window_bounds = array<i64: 256, 128>}, {pipeline_mode = #tpu.pipeline_mode<synchronous>, transform_indices = @transform_6, window_bounds = array<i64: 1, 128>}, {transform_indices = @transform_7, window_bounds = array<i64: 8, 128>}]} {
    %c0 = arith.constant 0 : index
    %c0_0 = arith.constant 0 : index
    %0 = vector.load %arg1[%c0, %c0_0] : memref<8x128xf32, #tpu.memory_space<vmem>>, vector<8x128xf32>
    %c0_1 = arith.constant 0 : index
    %c0_2 = arith.constant 0 : index
    %1 = vector.load %arg2[%c0_1, %c0_2] : memref<128x256xf32, #tpu.memory_space<vmem>>, vector<128x256xf32>
    %c0_3 = arith.constant 0 : index
    %c0_4 = arith.constant 0 : index
    %2 = vector.load %arg3[%c0_3, %c0_4] : memref<1x256xf32, #tpu.memory_space<vmem>>, vector<1x256xf32>
    %cst = arith.constant dense<0.000000e+00> : vector<8x256xf32>
    %3 = tpu.matmul %0, %1, %cst {dimension_numbers = #tpu.dot_dimension_numbers<[1], [0], [0], [1], [0, 0, 1, 1], [], []>} : vector<8x128xf32>, vector<128x256xf32>, vector<8x256xf32> -> vector<8x256xf32>
    %4 = vector.broadcast %2 : vector<1x256xf32> to vector<8x256xf32>
    %5 = arith.addf %3, %4 : vector<8x256xf32>
    %cst_5 = arith.constant 1.000000e-01 : f32
    %6 = vector.broadcast %cst_5 : f32 to vector<8x256xf32>
    %7 = arith.mulf %6, %5 : vector<8x256xf32>
    %8 = arith.maximumf %5, %7 : vector<8x256xf32>
    %c0_6 = arith.constant 0 : index
    %c0_7 = arith.constant 0 : index
    %9 = vector.load %arg4[%c0_6, %c0_7] : memref<256x256xf32, #tpu.memory_space<vmem>>, vector<256x256xf32>
    %c0_8 = arith.constant 0 : index
    %c0_9 = arith.constant 0 : index
    %10 = vector.load %arg5[%c0_8, %c0_9] : memref<1x256xf32, #tpu.memory_space<vmem>>, vector<1x256xf32>
    %cst_10 = arith.constant dense<0.000000e+00> : vector<8x256xf32>
    %11 = tpu.matmul %8, %9, %cst_10 {dimension_numbers = #tpu.dot_dimension_numbers<[1], [0], [0], [1], [0, 0, 1, 1], [], []>} : vector<8x256xf32>, vector<256x256xf32>, vector<8x256xf32> -> vector<8x256xf32>
    %12 = vector.broadcast %10 : vector<1x256xf32> to vector<8x256xf32>
    %13 = arith.addf %11, %12 : vector<8x256xf32>
    %cst_11 = arith.constant 1.000000e-01 : f32
    %14 = vector.broadcast %cst_11 : f32 to vector<8x256xf32>
    %15 = arith.mulf %14, %13 : vector<8x256xf32>
    %16 = arith.maximumf %13, %15 : vector<8x256xf32>
    %c0_12 = arith.constant 0 : index
    %c0_13 = arith.constant 0 : index
    %17 = vector.load %arg6[%c0_12, %c0_13] : memref<256x128xf32, #tpu.memory_space<vmem>>, vector<256x128xf32>
    %c0_14 = arith.constant 0 : index
    %c0_15 = arith.constant 0 : index
    %18 = vector.load %arg7[%c0_14, %c0_15] : memref<1x128xf32, #tpu.memory_space<vmem>>, vector<1x128xf32>
    %cst_16 = arith.constant dense<0.000000e+00> : vector<8x128xf32>
    %19 = tpu.matmul %16, %17, %cst_16 {dimension_numbers = #tpu.dot_dimension_numbers<[1], [0], [0], [1], [0, 0, 1, 1], [], []>} : vector<8x256xf32>, vector<256x128xf32>, vector<8x128xf32> -> vector<8x128xf32>
    %20 = vector.broadcast %18 : vector<1x128xf32> to vector<8x128xf32>
    %21 = arith.addf %19, %20 : vector<8x128xf32>
    %22 = arith.addf %0, %21 : vector<8x128xf32>
    %c0_17 = arith.constant 0 : index
    %c0_18 = arith.constant 0 : index
    %23 = vector.load %arg8[%c0_17, %c0_18] : memref<8x128xf32, #tpu.memory_space<vmem>>, vector<8x128xf32>
    tpu.vector_store %arg8[%c0_17, %c0_18], %22 {strides = array<i32>} : memref<8x128xf32, #tpu.memory_space<vmem>>, vector<8x128xf32>,
    return
  }
  func.func @transform_0(%arg0: i32) -> (i32, i32) {
    %c0_i32 = arith.constant 0 : i32
    %c0_i32_0 = arith.constant 0 : i32
    return %arg0, %c0_i32 : i32, i32
  }
  func.func @transform_1(%arg0: i32) -> (i32, i32) {
    %c0_i32 = arith.constant 0 : i32
    %c0_i32_0 = arith.constant 0 : i32
    %c0_i32_1 = arith.constant 0 : i32
    return %c0_i32, %c0_i32_0 : i32, i32
  }
  func.func @transform_2(%arg0: i32) -> (i32, i32) {
    %c0_i32 = arith.constant 0 : i32
    %c0_i32_0 = arith.constant 0 : i32
    %c0_i32_1 = arith.constant 0 : i32
    return %c0_i32, %c0_i32_0 : i32, i32
  }
  func.func @transform_3(%arg0: i32) -> (i32, i32) {
    %c0_i32 = arith.constant 0 : i32
    %c0_i32_0 = arith.constant 0 : i32
    %c0_i32_1 = arith.constant 0 : i32
    return %c0_i32, %c0_i32_0 : i32, i32
  }
  func.func @transform_4(%arg0: i32) -> (i32, i32) {
    %c0_i32 = arith.constant 0 : i32
    %c0_i32_0 = arith.constant 0 : i32
    %c0_i32_1 = arith.constant 0 : i32
    return %c0_i32, %c0_i32_0 : i32, i32
  }
  func.func @transform_5(%arg0: i32) -> (i32, i32) {
    %c0_i32 = arith.constant 0 : i32
    %c0_i32_0 = arith.constant 0 : i32
    %c0_i32_1 = arith.constant 0 : i32
    return %c0_i32, %c0_i32_0 : i32, i32
  }
  func.func @transform_6(%arg0: i32) -> (i32, i32) {
    %c0_i32 = arith.constant 0 : i32
    %c0_i32_0 = arith.constant 0 : i32
    %c0_i32_1 = arith.constant 0 : i32
    return %c0_i32, %c0_i32_0 : i32, i32
  }
  func.func @transform_7(%arg0: i32) -> (i32, i32) {
    %c0_i32 = arith.constant 0 : i32
    %c0_i32_0 = arith.constant 0 : i32
    return %arg0, %c0_i32 : i32, i32
  }
}

module attributes {stable_mosaic.version = 11 : i64} {
  func.func @_coupling_kernel(%arg0: i32, %arg1: memref<8x128xf32, #tpu.memory_space<vmem>>, %arg2: memref<128x256xf32, #tpu.memory_space<vmem>>, %arg3: memref<1x256xf32, #tpu.memory_space<vmem>>, %arg4: memref<256x256xf32, #tpu.memory_space<vmem>>, %arg5: memref<1x256xf32, #tpu.memory_space<vmem>>, %arg6: memref<256x128xf32, #tpu.memory_space<vmem>>, %arg7: memref<1x128xf32, #tpu.memory_space<vmem>>, %arg8: memref<8x128xf32, #tpu.memory_space<vmem>>) attributes {dimension_semantics = [#tpu.dimension_semantics<parallel>], iteration_bounds = array<i64: 2>, scalar_prefetch = 0 : i64, scratch_operands = 0 : i64, tpu.core_type = #tpu.core_type<tc>, window_params = [{transform_indices = @transform_0, window_bounds = array<i64: 8, 128>}, {pipeline_mode = #tpu.pipeline_mode<synchronous>, transform_indices = @transform_1, window_bounds = array<i64: 128, 256>}, {pipeline_mode = #tpu.pipeline_mode<synchronous>, transform_indices = @transform_2, window_bounds = array<i64: 1, 256>}, {pipeline_mode = #tpu.pipeline_mode<synchronous>, transform_indices = @transform_3, window_bounds = array<i64: 256, 256>}, {pipeline_mode = #tpu.pipeline_mode<synchronous>, transform_indices = @transform_4, window_bounds = array<i64: 1, 256>}, {pipeline_mode = #tpu.pipeline_mode<synchronous>, transform_indices = @transform_5, window_bounds = array<i64: 256, 128>}, {pipeline_mode = #tpu.pipeline_mode<synchronous>, transform_indices = @transform_6, window_bounds = array<i64: 1, 128>}, {transform_indices = @transform_7, window_bounds = array<i64: 8, 128>}]} {
    %c0 = arith.constant 0 : index
    %c0_0 = arith.constant 0 : index
    %0 = vector.load %arg1[%c0, %c0_0] : memref<8x128xf32, #tpu.memory_space<vmem>>, vector<8x128xf32>
    %c0_1 = arith.constant 0 : index
    %c0_2 = arith.constant 0 : index
    %1 = vector.load %arg2[%c0_1, %c0_2] : memref<128x256xf32, #tpu.memory_space<vmem>>, vector<128x256xf32>
    %c0_3 = arith.constant 0 : index
    %c0_4 = arith.constant 0 : index
    %2 = vector.load %arg3[%c0_3, %c0_4] : memref<1x256xf32, #tpu.memory_space<vmem>>, vector<1x256xf32>
    %cst = arith.constant dense<0.000000e+00> : vector<8x256xf32>
    %3 = tpu.matmul %0, %1, %cst {dimension_numbers = #tpu.dot_dimension_numbers<[1], [0], [0], [1], [0, 0, 1, 1], [], []>} : vector<8x128xf32>, vector<128x256xf32>, vector<8x256xf32> -> vector<8x256xf32>
    %4 = vector.broadcast %2 : vector<1x256xf32> to vector<8x256xf32>
    %5 = arith.addf %3, %4 : vector<8x256xf32>
    %cst_5 = arith.constant 1.000000e-01 : f32
    %6 = vector.broadcast %cst_5 : f32 to vector<8x256xf32>
    %7 = arith.mulf %6, %5 : vector<8x256xf32>
    %8 = arith.maximumf %5, %7 : vector<8x256xf32>
    %c0_6 = arith.constant 0 : index
    %c0_7 = arith.constant 0 : index
    %9 = vector.load %arg4[%c0_6, %c0_7] : memref<256x256xf32, #tpu.memory_space<vmem>>, vector<256x256xf32>
    %c0_8 = arith.constant 0 : index
    %c0_9 = arith.constant 0 : index
    %10 = vector.load %arg5[%c0_8, %c0_9] : memref<1x256xf32, #tpu.memory_space<vmem>>, vector<1x256xf32>
    %cst_10 = arith.constant dense<0.000000e+00> : vector<8x256xf32>
    %11 = tpu.matmul %8, %9, %cst_10 {dimension_numbers = #tpu.dot_dimension_numbers<[1], [0], [0], [1], [0, 0, 1, 1], [], []>} : vector<8x256xf32>, vector<256x256xf32>, vector<8x256xf32> -> vector<8x256xf32>
    %12 = vector.broadcast %10 : vector<1x256xf32> to vector<8x256xf32>
    %13 = arith.addf %11, %12 : vector<8x256xf32>
    %cst_11 = arith.constant 1.000000e-01 : f32
    %14 = vector.broadcast %cst_11 : f32 to vector<8x256xf32>
    %15 = arith.mulf %14, %13 : vector<8x256xf32>
    %16 = arith.maximumf %13, %15 : vector<8x256xf32>
    %c0_12 = arith.constant 0 : index
    %c0_13 = arith.constant 0 : index
    %17 = vector.load %arg6[%c0_12, %c0_13] : memref<256x128xf32, #tpu.memory_space<vmem>>, vector<256x128xf32>
    %c0_14 = arith.constant 0 : index
    %c0_15 = arith.constant 0 : index
    %18 = vector.load %arg7[%c0_14, %c0_15] : memref<1x128xf32, #tpu.memory_space<vmem>>, vector<1x128xf32>
    %cst_16 = arith.constant dense<0.000000e+00> : vector<8x128xf32>
    %19 = tpu.matmul %16, %17, %cst_16 {dimension_numbers = #tpu.dot_dimension_numbers<[1], [0], [0], [1], [0, 0, 1, 1], [], []>} : vector<8x256xf32>, vector<256x128xf32>, vector<8x128xf32> -> vector<8x128xf32>
    %20 = vector.broadcast %18 : vector<1x128xf32> to vector<8x128xf32>
    %21 = arith.addf %19, %20 : vector<8x128xf32>
    %22 = arith.addf %0, %21 : vector<8x128xf32>
    %c0_17 = arith.constant 0 : index
    %c0_18 = arith.constant 0 : index
    %23 = vector.load %arg8[%c0_17, %c0_18] : memref<8x128xf32, #tpu.memory_space<vmem>>, vector<8x128xf32>
    tpu.vector_store %arg8[%c0_17, %c0_18], %22 {strides = array<i32>} : memref<8x128xf32, #tpu.memory_space<vmem>>, vector<8x128xf32>,
    return
  }
  func.func @transform_0(%arg0: i32) -> (i32, i32) {
    %c0_i32 = arith.constant 0 : i32
    %c0_i32_0 = arith.constant 0 : i32
    return %arg0, %c0_i32 : i32, i32
  }
  func.func @transform_1(%arg0: i32) -> (i32, i32) {
    %c0_i32 = arith.constant 0 : i32
    %c0_i32_0 = arith.constant 0 : i32
    %c0_i32_1 = arith.constant 0 : i32
    return %c0_i32, %c0_i32_0 : i32, i32
  }
  func.func @transform_2(%arg0: i32) -> (i32, i32) {
    %c0_i32 = arith.constant 0 : i32
    %c0_i32_0 = arith.constant 0 : i32
    %c0_i32_1 = arith.constant 0 : i32
    return %c0_i32, %c0_i32_0 : i32, i32
  }
  func.func @transform_3(%arg0: i32) -> (i32, i32) {
    %c0_i32 = arith.constant 0 : i32
    %c0_i32_0 = arith.constant 0 : i32
    %c0_i32_1 = arith.constant 0 : i32
    return %c0_i32, %c0_i32_0 : i32, i32
  }
  func.func @transform_4(%arg0: i32) -> (i32, i32) {
    %c0_i32 = arith.constant 0 : i32
    %c0_i32_0 = arith.constant 0 : i32
    %c0_i32_1 = arith.constant 0 : i32
    return %c0_i32, %c0_i32_0 : i32, i32
  }
  func.func @transform_5(%arg0: i32) -> (i32, i32) {
    %c0_i32 = arith.constant 0 : i32
    %c0_i32_0 = arith.constant 0 : i32
    %c0_i32_1 = arith.constant 0 : i32
    return %c0_i32, %c0_i32_0 : i32, i32
  }
  func.func @transform_6(%arg0: i32) -> (i32, i32) {
    %c0_i32 = arith.constant 0 : i32
    %c0_i32_0 = arith.constant 0 : i32
    %c0_i32_1 = arith.constant 0 : i32
    return %c0_i32, %c0_i32_0 : i32, i32
  }
  func.func @transform_7(%arg0: i32) -> (i32, i32) {
    %c0_i32 = arith.constant 0 : i32
    %c0_i32_0 = arith.constant 0 : i32
    return %arg0, %c0_i32 : i32, i32
  }
}

</mosaic_0001>

<bundles_post_ra>
// kernel: additive_coupling_forward.1
= control target key start
LH: loop header
LB: loop body
LE: loop exit
PB: predicated region body
PF: predicated region fallthrough
CT: control target
= control target key end

     0   :  { %s940_s24 = smov 0   ;;  %s1371_s0 = inlined_call_operand.vmem [shape: f32[16,128], index: 0, kind: input, shape index: {}, may-alias: {0,7}]   ;;  %s1372_s1 = inlined_call_operand.vmem [shape: f32[128,256], index: 1, kind: input, shape index: {}]   ;;  %s1373_s2 = inlined_call_operand.vmem [shape: f32[1,256], index: 2, kind: input, shape index: {}]   ;;  %s1374_s3 = inlined_call_operand.vmem [shape: f32[256,256], index: 3, kind: input, shape index: {}]   ;;  %s1375_s4 = inlined_call_operand.vmem [shape: f32[1,256], index: 4, kind: input, shape index: {}]   ;;  %s1376_s5 = inlined_call_operand.vmem [shape: f32[256,128], index: 5, kind: input, shape index: {}]   ;;  %s1377_s6 = inlined_call_operand.vmem [shape: f32[1,128], index: 6, kind: input, shape index: {}]   ;;  %s1378_s7 = inlined_call_operand.vmem [shape: f32[16,128], index: 7, kind: output, shape index: {}, may-alias: {0,7}]  }
   0x1 LB: > { %s709_s25 = sadd.s32 4294967295, %s897_s24   ;;  %p713_p0 = scmp.ge.s32.totalorder %s897_s24, 1  ;;  %s897_s24 = sphi %s940_s24, %s17_s24  }
   0x2   : > { %p236_p1 = scmp.lt.s32.totalorder %s897_s24, 3 }
   0x4   : > { %p237_p2 = pnand %p713_p0, %p236_p1 }
   0x5   : > { %v276_v0 = vld [vmem:[%s1372_s1 + $0x8] sm:$0xff] (!%p237_p2)  ;;  %v278_v1 = vld [vmem:[%s1372_s1 + $0x18] sm:$0xff] (!%p237_p2)  ;;  %v275_v2 = vld [vmem:[%s1372_s1] sm:$0xff] (!%p237_p2)  ;;  %v899_v7 = vmov (!%p237_p2), 0.0   ;;  %p1070_p3 = scmp.lt.s32.totalorder (!%p237_p2), %s709_s25, 1 }
   0x6   : > { %240 = sbr.rel (%p237_p2) target bundleno = 700 (0x2bc), region = 48  ;;  %v754_v3 = vpack.c.bf16 (!%p237_p2), %v278_v1, %v276_v0  ;;  %v277_v4 = vld [vmem:[%s1372_s1 + $0x10] sm:$0xff] (!%p237_p2)  ;;  %v280_v5 = vld [vmem:[%s1372_s1 + $0x28] sm:$0xff] (!%p237_p2)  ;;  %v282_v6 = vld [vmem:[%s1372_s1 + $0x38] sm:$0xff] (!%p237_p2)  ;;  %383 = vmatprep.mubr.f32.mxu0 (!%p237_p2), %v899_v7 }
   0x7   : > { %v756_v8 = vpack.c.bf16 (!%p237_p2), %v277_v4, %v275_v2  ;;  %v758_v9 = vpack.c.bf16 (!%p237_p2), %v282_v6, %v280_v5  ;;  %v279_v10 = vld [vmem:[%s1372_s1 + $0x20] sm:$0xff] (!%p237_p2)  ;;  %v281_v11 = vld [vmem:[%s1372_s1 + $0x30] sm:$0xff] (!%p237_p2)  ;;  %v284_v12 = vld [vmem:[%s1372_s1 + $0x48] sm:$0xff] (!%p237_p2) }
   0x8   : > { %755 = vmatprep.subr.bf16.mxu0 (!%p237_p2), %v754_v3  ;;  %v286_v13 = vld [vmem:[%s1372_s1 + $0x58] sm:$0xff] (!%p237_p2)  ;;  %v760_v14 = vpack.c.bf16 (!%p237_p2), %v281_v11, %v279_v10  ;;  %v283_v16 = vld [vmem:[%s1372_s1 + $0x40] sm:$0xff] (!%p237_p2)  ;;  %v285_v17 = vld [vmem:[%s1372_s1 + $0x50] sm:$0xff] (!%p237_p2) }
   0x9   : > { %757 = vmatpush1.bf16.msra.mxu0 (!%p237_p2), %v756_v8  ;;  %v762_v15 = vpack.c.bf16 (!%p237_p2), %v286_v13, %v284_v12  ;;  %v288_v18 = vld [vmem:[%s1372_s1 + $0x68] sm:$0xff] (!%p237_p2)  ;;  %v290_v19 = vld [vmem:[%s1372_s1 + $0x78] sm:$0xff] (!%p237_p2)  ;;  %v764_v20 = vpack.c.bf16 (!%p237_p2), %v285_v17, %v283_v16  ;;  %v287_v22 = vld [vmem:[%s1372_s1 + $0x60] sm:$0xff] (!%p237_p2) }
   0xa   : > { %759 = vmatprep.subr.bf16.mxu0 (!%p237_p2), %v758_v9  ;;  %v766_v21 = vpack.c.bf16 (!%p237_p2), %v290_v19, %v288_v18  ;;  %v289_v23 = vld [vmem:[%s1372_s1 + $0x70] sm:$0xff] (!%p237_p2)  ;;  %v292_v24 = vld [vmem:[%s1372_s1 + $0x88] sm:$0xff] (!%p237_p2)  ;;  %v294_v25 = vld [vmem:[%s1372_s1 + $0x98] sm:$0xff] (!%p237_p2) }
   0xb   : > { %v291_v26 = vld [vmem:[%s1372_s1 + $0x80] sm:$0xff] (!%p237_p2)  ;;  %v293_v27 = vld [vmem:[%s1372_s1 + $0x90] sm:$0xff] (!%p237_p2)  ;;  %v395_v28 = vld [vmem:[%s1374_s3 + $0x8] sm:$0xff] (!%p237_p2)  ;;  %v768_v31 = vpack.c.bf16 (!%p237_p2), %v289_v23, %v287_v22  ;;  %v770_v36 = vpack.c.bf16 (!%p237_p2), %v294_v25, %v292_v24 }
   0xc   : > { %v397_v29 = vld [vmem:[%s1374_s3 + $0x18] sm:$0xff] (!%p237_p2)  ;;  %v394_v30 = vld [vmem:[%s1374_s3] sm:$0xff] (!%p237_p2)  ;;  %v396_v33 = vld [vmem:[%s1374_s3 + $0x10] sm:$0xff] (!%p237_p2)  ;;  %v772_v46 = vpack.c.bf16 (!%p237_p2), %v293_v27, %v291_v26 }
   0xd   : > { %761 = vmatpush1.bf16.msra.mxu0 %v760_v14  ;;  %v786_v32 = vpack.c.bf16 %v397_v29, %v395_v28  ;;  %v399_v34 = vld [vmem:[%s1374_s3 + $0x28] sm:$0xff]  ;;  %v401_v35 = vld [vmem:[%s1374_s3 + $0x38] sm:$0xff]  ;;  %v788_v37 = vpack.c.bf16 %v396_v33, %v394_v30  ;;  %v398_v39 = vld [vmem:[%s1374_s3 + $0x20] sm:$0xff]  ;;  %s1381_s25 = smov (!%p1070_p3, %s709_s25), 1 }
   0xe   : > { %763 = vmatprep.subr.bf16.mxu0 %v762_v15  ;;  %v790_v38 = vpack.c.bf16 %v401_v35, %v399_v34  ;;  %v400_v40 = vld [vmem:[%s1374_s3 + $0x30] sm:$0xff]  ;;  %v403_v41 = vld [vmem:[%s1374_s3 + $0x48] sm:$0xff]  ;;  %v298_v43 = vld [vmem:[%s1372_s1 + $0xb8] sm:$0xff]  ;;  %s714_s30 = sshll.u32 %s1381_s25, 3 }
   0xf   : > { %v296_v42 = vld [vmem:[%s1372_s1 + $0xa8] sm:$0xff]  ;;  %787 = vmatprep.subr.bf16.mxu1 %v786_v32  ;;  %v405_v44 = vld [vmem:[%s1374_s3 + $0x58] sm:$0xff]  ;;  %v792_v45 = vpack.c.bf16 %v400_v40, %v398_v39  ;;  %v295_v47 = vld [vmem:[%s1372_s1 + $0xa0] sm:$0xff]  ;;  %s269_s14 = scalar_lea.vmem %s1371_s0, %s714_s30  ;;  %s273_s29 = scalar_lea.vmem %s1378_s7, %s714_s30 }
  0x10   : > { %789 = vmatpush1.bf16.msra.mxu1 %v788_v37  ;;  %v794_v48 = vpack.c.bf16 %v405_v44, %v403_v41  ;;  %v402_v49 = vld [vmem:[%s1374_s3 + $0x40] sm:$0xff]  ;;  %v404_v50 = vld [vmem:[%s1374_s3 + $0x50] sm:$0xff]  ;;  %v774_v51 = vpack.c.bf16 %v298_v43, %v296_v42  ;;  %v407_v53 = vld [vmem:[%s1374_s3 + $0x68] sm:$0xff] }
  0x11   : > { %765 = vmatpush1.bf16.msra.mxu0 %v764_v20  ;;  %791 = vmatprep.subr.bf16.mxu1 %v790_v38  ;;  %v297_v52 = vld [vmem:[%s1372_s1 + $0xb0] sm:$0xff]  ;;  %v409_v54 = vld [vmem:[%s1374_s3 + $0x78] sm:$0xff]  ;;  %v300_v55 = vld [vmem:[%s1372_s1 + $0xc8] sm:$0xff]  ;;  %v796_v57 = vpack.c.bf16 %v404_v50, %v402_v49 }
  0x12   : > { %767 = vmatprep.subr.bf16.mxu0 %v766_v21  ;;  %v302_v56 = vld [vmem:[%s1372_s1 + $0xd8] sm:$0xff]  ;;  %v776_v58 = vpack.c.bf16 %v297_v52, %v295_v47  ;;  %v299_v59 = vld [vmem:[%s1372_s1 + $0xc0] sm:$0xff]  ;;  %v798_v60 = vpack.c.bf16 %v409_v54, %v407_v53  ;;  %v408_v62 = vld [vmem:[%s1374_s3 + $0x70] sm:$0xff] }
  0x13   : > { %v406_v61 = vld [vmem:[%s1374_s3 + $0x60] sm:$0xff]  ;;  %v778_v63 = vpack.c.bf16 %v302_v56, %v300_v55  ;;  %v301_v0 = vld [vmem:[%s1372_s1 + $0xd0] sm:$0xff]  ;;  %v411_v1 = vld [vmem:[%s1374_s3 + $0x88] sm:$0xff] }
  0x14   : > { %793 = vmatpush1.bf16.msra.mxu1 %v792_v45  ;;  %v413_v2 = vld [vmem:[%s1374_s3 + $0x98] sm:$0xff]  ;;  %v304_v3 = vld [vmem:[%s1372_s1 + $0xe8] sm:$0xff]  ;;  %v800_v5 = vpack.c.bf16 %v408_v62, %v406_v61  ;;  %v780_v6 = vpack.c.bf16 %v301_v0, %v299_v59  ;;  %v303_v7 = vld [vmem:[%s1372_s1 + $0xe0] sm:$0xff] }
  0x15   : > { %769 = vmatpush1.bf16.msra.mxu0 %v768_v31  ;;  %795 = vmatprep.subr.bf16.mxu1 %v794_v48  ;;  %v306_v4 = vld [vmem:[%s1372_s1 + $0xf8] sm:$0xff]  ;;  %v802_v8 = vpack.c.bf16 %v413_v2, %v411_v1  ;;  %v410_v9 = vld [vmem:[%s1374_s3 + $0x80] sm:$0xff]  ;;  %v412_v10 = vld [vmem:[%s1374_s3 + $0x90] sm:$0xff] }
  0x16   : > { %771 = vmatprep.subr.bf16.mxu0 %v770_v36  ;;  %v782_v11 = vpack.c.bf16 %v306_v4, %v304_v3  ;;  %v305_v12 = vld [vmem:[%s1372_s1 + $0xf0] sm:$0xff]  ;;  %v415_v13 = vld [vmem:[%s1374_s3 + $0xa8] sm:$0xff]  ;;  %v417_v14 = vld [vmem:[%s1374_s3 + $0xb8] sm:$0xff]  ;;  %v804_v15 = vpack.c.bf16 %v412_v10, %v410_v9 }
  0x17   : > { %v784_v16 = vpack.c.bf16 %v305_v12, %v303_v7  ;;  %v806_v17 = vpack.c.bf16 %v417_v14, %v415_v13  ;;  %v414_v18 = vld [vmem:[%s1374_s3 + $0xa0] sm:$0xff]  ;;  %v416_v19 = vld [vmem:[%s1374_s3 + $0xb0] sm:$0xff]  ;;  %v419_v20 = vld [vmem:[%s1374_s3 + $0xc8] sm:$0xff] }
  0x18   : > { %797 = vmatpush1.bf16.msra.mxu1 %v796_v57  ;;  %v421_v21 = vld [vmem:[%s1374_s3 + $0xd8] sm:$0xff]  ;;  %v808_v22 = vpack.c.bf16 %v416_v19, %v414_v18  ;;  %v1140_v23 = vld [vmem:[%s269_s14] sm:$0xff]  ;;  %v420_v26 = vld [vmem:[%s1374_s3 + $0xd0] sm:$0xff] }
  0x19   : > { %773 = vmatpush1.bf16.msra.mxu0 %v772_v46  ;;  %799 = vmatprep.subr.bf16.mxu1 %v798_v60  ;;  %v810_v24 = vpack.c.bf16 %v421_v21, %v419_v20  ;;  %v418_v25 = vld [vmem:[%s1374_s3 + $0xc0] sm:$0xff]  ;;  %v423_v27 = vld [vmem:[%s1374_s3 + $0xe8] sm:$0xff]  ;;  %v425_v28 = vld [vmem:[%s1374_s3 + $0xf8] sm:$0xff] }
  0x1a   : > { %775 = vmatprep.subr.bf16.mxu0 %v774_v51  ;;  %v812_v29 = vpack.c.bf16 %v420_v26, %v418_v25  ;;  %v814_v30 = vpack.c.bf16 %v425_v28, %v423_v27  ;;  %v422_v31 = vld [vmem:[%s1374_s3 + $0xe0] sm:$0xff]  ;;  %v424_v32 = vld [vmem:[%s1374_s3 + $0xf0] sm:$0xff]  ;;  %v427_v33 = vld [vmem:[%s1374_s3 + $0x108] sm:$0xff] }
  0x1b   : > { %v429_v34 = vld [vmem:[%s1374_s3 + $0x118] sm:$0xff]  ;;  %v816_v35 = vpack.c.bf16 %v424_v32, %v422_v31  ;;  %v426_v37 = vld [vmem:[%s1374_s3 + $0x100] sm:$0xff]  ;;  %v428_v38 = vld [vmem:[%s1374_s3 + $0x110] sm:$0xff] }
  0x1c   : > { %801 = vmatpush1.bf16.msra.mxu1 %v800_v5  ;;  %v818_v36 = vpack.c.bf16 %v429_v34, %v427_v33  ;;  %v431_v39 = vld [vmem:[%s1374_s3 + $0x128] sm:$0xff]  ;;  %v433_v40 = vld [vmem:[%s1374_s3 + $0x138] sm:$0xff]  ;;  %v820_v41 = vpack.c.bf16 %v428_v38, %v426_v37  ;;  %v430_v43 = vld [vmem:[%s1374_s3 + $0x120] sm:$0xff] }
  0x1d   : > { %777 = vmatpush1.bf16.msra.mxu0 %v776_v58  ;;  %803 = vmatprep.subr.bf16.mxu1 %v802_v8  ;;  %v822_v42 = vpack.c.bf16 %v433_v40, %v431_v39  ;;  %v432_v44 = vld [vmem:[%s1374_s3 + $0x130] sm:$0xff]  ;;  %v435_v45 = vld [vmem:[%s1374_s3 + $0x148] sm:$0xff]  ;;  %v437_v46 = vld [vmem:[%s1374_s3 + $0x158] sm:$0xff] }
  0x1e   : > { %779 = vmatprep.subr.bf16.mxu0 %v778_v63  ;;  %v824_v47 = vpack.c.bf16 %v432_v44, %v430_v43  ;;  %v826_v48 = vpack.c.bf16 %v437_v46, %v435_v45  ;;  %v434_v49 = vld [vmem:[%s1374_s3 + $0x140] sm:$0xff]  ;;  %v436_v50 = vld [vmem:[%s1374_s3 + $0x150] sm:$0xff]  ;;  %v439_v51 = vld [vmem:[%s1374_s3 + $0x168] sm:$0xff] }
  0x1f   : > { %v441_v52 = vld [vmem:[%s1374_s3 + $0x178] sm:$0xff]  ;;  %v828_v53 = vpack.c.bf16 %v436_v50, %v434_v49  ;;  %v438_v55 = vld [vmem:[%s1374_s3 + $0x160] sm:$0xff]  ;;  %v440_v56 = vld [vmem:[%s1374_s3 + $0x170] sm:$0xff] }
  0x20   : > { %805 = vmatpush1.bf16.msra.mxu1 %v804_v15  ;;  %v830_v54 = vpack.c.bf16 %v441_v52, %v439_v51  ;;  %v443_v57 = vld [vmem:[%s1374_s3 + $0x188] sm:$0xff]  ;;  %v445_v58 = vld [vmem:[%s1374_s3 + $0x198] sm:$0xff]  ;;  %v832_v59 = vpack.c.bf16 %v440_v56, %v438_v55  ;;  %v442_v61 = vld [vmem:[%s1374_s3 + $0x180] sm:$0xff]  ;;  %v309_v55 = vlaneseq }
  0x21   : > { %781 = vmatpush1.bf16.msra.mxu0 %v780_v6  ;;  %807 = vmatprep.subr.bf16.mxu1 %v806_v17  ;;  %v834_v60 = vpack.c.bf16 %v445_v58, %v443_v57  ;;  %v444_v62 = vld [vmem:[%s1374_s3 + $0x190] sm:$0xff]  ;;  %v447_v63 = vld [vmem:[%s1374_s3 + $0x1a8] sm:$0xff]  ;;  %v449_v0 = vld [vmem:[%s1374_s3 + $0x1b8] sm:$0xff] }
  0x22   : > { %783 = vmatprep.subr.bf16.mxu0 %v782_v11  ;;  %v836_v1 = vpack.c.bf16 %v444_v62, %v442_v61  ;;  %v838_v2 = vpack.c.bf16 %v449_v0, %v447_v63  ;;  %v446_v3 = vld [vmem:[%s1374_s3 + $0x1a0] sm:$0xff]  ;;  %v448_v4 = vld [vmem:[%s1374_s3 + $0x1b0] sm:$0xff]  ;;  %v451_v6 = vld [vmem:[%s1374_s3 + $0x1c8] sm:$0xff]  ;;  %v310_v56 = vshrl.u32 %v309_v55, 7 }
  0x23   : > { %v840_v5 = vpack.c.bf16 %v448_v4, %v446_v3  ;;  %v453_v7 = vld [vmem:[%s1374_s3 + $0x1d8] sm:$0xff]  ;;  %v450_v9 = vld [vmem:[%s1374_s3 + $0x1c0] sm:$0xff]  ;;  %v452_v10 = vld [vmem:[%s1374_s3 + $0x1d0] sm:$0xff] }
  0x24   : > { %809 = vmatpush1.bf16.msra.mxu1 %v808_v22  ;;  %v842_v8 = vpack.c.bf16 %v453_v7, %v451_v6  ;;  %v844_v11 = vpack.c.bf16 %v452_v10, %v450_v9  ;;  %v455_v12 = vld [vmem:[%s1374_s3 + $0x1e8] sm:$0xff]  ;;  %v457_v13 = vld [vmem:[%s1374_s3 + $0x1f8] sm:$0xff]  ;;  %v454_v15 = vld [vmem:[%s1374_s3 + $0x1e0] sm:$0xff]  ;;  %v311_v57 = vsub.s32 0, %v310_v56 }
  0x25   : > { %785 = vmatpush1.bf16.msra.mxu0 %v784_v16  ;;  %811 = vmatprep.subr.bf16.mxu1 %v810_v24  ;;  %v846_v14 = vpack.c.bf16 %v457_v13, %v455_v12  ;;  %v456_v16 = vld [vmem:[%s1374_s3 + $0x1f0] sm:$0xff]  ;;  %v561_v18 = vld [vmem:[%s1376_s5 + $0x80] sm:$0xff]  ;;  %v562_v19 = vld [vmem:[%s1376_s5 + $0x88] sm:$0xff] }
  0x26   : > { %v848_v17 = vpack.c.bf16 %v456_v16, %v454_v15  ;;  %v545_v20 = vld [vmem:[%s1376_s5] sm:$0xff]  ;;  %v850_v21 = vpack.c.bf16 %v562_v19, %v561_v18  ;;  %v546_v22 = vld [vmem:[%s1376_s5 + $0x8] sm:$0xff]  ;;  %v563_v24 = vld [vmem:[%s1376_s5 + $0x90] sm:$0xff] }
  0x27   : > { %v564_v25 = vld [vmem:[%s1376_s5 + $0x98] sm:$0xff]  ;;  %v852_v26 = vpack.c.bf16 %v546_v22, %v545_v20  ;;  %v547_v28 = vld [vmem:[%s1376_s5 + $0x10] sm:$0xff]  ;;  %v566_v31 = vld [vmem:[%s1376_s5 + $0xa8] sm:$0xff] }
  0x28   : > { %384 = vmatmul.mubr.f32.vlgmr.msra.gmra.mrb[0].mxu0 %v1140_v23  ;;  %813 = vmatpush1.bf16.msra.mxu1 %v812_v29  ;;  %v854_v27 = vpack.c.bf16 %v564_v25, %v563_v24  ;;  %v548_v29 = vld [vmem:[%s1376_s5 + $0x18] sm:$0xff]  ;;  %v549_v34 = vld [vmem:[%s1376_s5 + $0x20] sm:$0xff]  ;;  %v551_v40 = vld [vmem:[%s1376_s5 + $0x30] sm:$0xff] }
  0x29   : > { %815 = vmatprep.subr.bf16.mxu1 %v814_v30  ;;  %v565_v30 = vld [vmem:[%s1376_s5 + $0xa0] sm:$0xff]  ;;  %851 = vmatprep.subr.bf16.mxu0 %v850_v21  ;;  %v856_v32 = vpack.c.bf16 %v548_v29, %v547_v28  ;;  %v568_v37 = vld [vmem:[%s1376_s5 + $0xb8] sm:$0xff]  ;;  %v570_v43 = vld [vmem:[%s1376_s5 + $0xc8] sm:$0xff] }
  0x2a   : > { %853 = vmatpush3.bf16.msra.mxu0 %v852_v26  ;;  %v858_v33 = vpack.c.bf16 %v566_v31, %v565_v30  ;;  %v553_v46 = vld [vmem:[%s1376_s5 + $0x40] sm:$0xff]  ;;  %v572_v49 = vld [vmem:[%s1376_s5 + $0xd8] sm:$0xff]  ;;  %v555_v52 = vld [vmem:[%s1376_s5 + $0x50] sm:$0xff] }
  0x2b   : > { %855 = vmatprep.subr.bf16.mxu0 %v854_v27  ;;  %v307_v58 = vld [vmem:[%s1373_s2] sm:$0x3]  ;;  %v574_v7 = vld [vmem:[%s1376_s5 + $0xe8] sm:$0xff]  ;;  %v575_v12 = vld [vmem:[%s1376_s5 + $0xf0] sm:$0xff] }
  0x2c   : > { %817 = vmatpush1.bf16.msra.mxu1 %v816_v35  ;;  %v550_v35 = vld [vmem:[%s1376_s5 + $0x28] sm:$0xff]  ;;  %v573_v6 = vld [vmem:[%s1376_s5 + $0xe0] sm:$0xff]  ;;  %v576_v13 = vld [vmem:[%s1376_s5 + $0xf8] sm:$0xff] }
  0x2d   : > { %819 = vmatprep.subr.bf16.mxu1 %v818_v36  ;;  %v567_v36 = vld [vmem:[%s1376_s5 + $0xb0] sm:$0xff]  ;;  %v860_v38 = vpack.c.bf16 %v550_v35, %v549_v34  ;;  %v557_v9 = vld [vmem:[%s1376_s5 + $0x60] sm:$0xff]  ;;  %v558_v10 = vld [vmem:[%s1376_s5 + $0x68] sm:$0xff] }
  0x2e   : > { %857 = vmatpush3.bf16.msra.mxu0 %v856_v32  ;;  %v862_v39 = vpack.c.bf16 %v568_v37, %v567_v36  ;;  %v559_v15 = vld [vmem:[%s1376_s5 + $0x70] sm:$0xff]  ;;  %v560_v16 = vld [vmem:[%s1376_s5 + $0x78] sm:$0xff]  ;;  %v458_v18 = vld [vmem:[%s1375_s4] sm:$0x3] }
  0x2f   : > { %859 = vmatprep.subr.bf16.mxu0 %v858_v33  ;;  %v463_v19 = vrot.slane %v458_v18, %v311_v57  ;;  %v716_v31 = vld [vmem:[%s1377_s6] ss:$0 sm:$0xff] }
  0x30   : > { %821 = vmatpush1.bf16.msra.mxu1 %v820_v41  ;;  %v552_v41 = vld [vmem:[%s1376_s5 + $0x38] sm:$0xff] }
  0x31   : > { %823 = vmatprep.subr.bf16.mxu1 %v822_v42  ;;  %v569_v42 = vld [vmem:[%s1376_s5 + $0xc0] sm:$0xff]  ;;  %v864_v44 = vpack.c.bf16 %v552_v41, %v551_v40 }
  0x32   : > { %861 = vmatpush3.bf16.msra.mxu0 %v860_v38  ;;  %v866_v45 = vpack.c.bf16 %v570_v43, %v569_v42 }
  0x33   : > { %863 = vmatprep.subr.bf16.mxu0 %v862_v39 }
  0x34   : > { %825 = vmatpush1.bf16.msra.mxu1 %v824_v47  ;;  %v554_v47 = vld [vmem:[%s1376_s5 + $0x48] sm:$0xff] }
  0x35   : > { %827 = vmatprep.subr.bf16.mxu1 %v826_v48  ;;  %v571_v48 = vld [vmem:[%s1376_s5 + $0xd0] sm:$0xff]  ;;  %v868_v50 = vpack.c.bf16 %v554_v47, %v553_v46 }
  0x36   : > { %865 = vmatpush3.bf16.msra.mxu0 %v864_v44  ;;  %v870_v51 = vpack.c.bf16 %v572_v49, %v571_v48 }
  0x37   : > { %867 = vmatprep.subr.bf16.mxu0 %v866_v45 }
  0x38   : > { %829 = vmatpush1.bf16.msra.mxu1 %v828_v53  ;;  %v556_v53 = vld [vmem:[%s1376_s5 + $0x58] sm:$0xff] }
  0x39   : > { %831 = vmatprep.subr.bf16.mxu1 %v830_v54  ;;  %v872_v54 = vpack.c.bf16 %v556_v53, %v555_v52 }
  0x3a   : > { %869 = vmatpush3.bf16.msra.mxu0 %v868_v50 }
  0x3b   : > { %871 = vmatprep.subr.bf16.mxu0 %v870_v51 }
  0x3c   : > { %833 = vmatpush1.bf16.msra.mxu1 %v832_v59  ;;  %v315_v59 = vsub.s32 1, %v310_v56 }
  0x3d   : > { %835 = vmatprep.subr.bf16.mxu1 %v834_v60  ;;  %v312_v60 = vrot.slane %v307_v58, %v311_v57 }
  0x3e   : > { %873 = vmatpush3.bf16.msra.mxu0 %v872_v54  ;;  %v316_v61 = vrot.slane %v307_v58, %v315_v59  ;;  %v467_v20 = vrot.slane %v458_v18, %v315_v59 }
  0x40   : > { %837 = vmatpush1.bf16.msra.mxu1 %v836_v1 }
  0x41   : > { %839 = vmatprep.subr.bf16.mxu1 %v838_v2 }
  0x44   : > { %841 = vmatpush1.bf16.msra.mxu1 %v840_v5 }
  0x45   : > { %843 = vmatprep.subr.bf16.mxu1 %v842_v8  ;;  %v874_v8 = vpack.c.bf16 %v574_v7, %v573_v6 }
  0x47   : > { %875 = vmatprep.subr.bf16.mxu0 %v874_v8 }
  0x48   : > { %845 = vmatpush1.bf16.msra.mxu1 %v844_v11  ;;  %v876_v11 = vpack.c.bf16 %v558_v10, %v557_v9 }
  0x49   : > { %847 = vmatprep.subr.bf16.mxu1 %v846_v14  ;;  %v878_v14 = vpack.c.bf16 %v576_v13, %v575_v12 }
  0x4a   : > { %877 = vmatpush3.bf16.msra.mxu0 %v876_v11 }
  0x4b   : > { %879 = vmatprep.subr.bf16.mxu0 %v878_v14 }
  0x4c   : > { %849 = vmatpush1.bf16.msra.mxu1 %v848_v17  ;;  %v880_v17 = vpack.c.bf16 %v560_v16, %v559_v15 }
  0x4e   : > { %881 = vmatpush3.bf16.msra.mxu0 %v880_v17 }
  0xfb   : > { %v385_v62 = vpop.f32.mrb[0].mxu0 }
  0xfc   : > { %v386_v63 = vadd.f32 %v385_v62, %v312_v60  ;;  %v387_v0 = vpop.f32.mrb[1].mxu0 }
  0xfd   : > { %v388_v1 = vadd.f32 %v387_v0, %v316_v61 }
  0xfe   : > { %v390_v2 = vmul.f32 0.1, %v386_v63 }
  0xff   : > { %v391_v3 = vmul.f32 0.1, %v388_v1 }
 0x100   : > { %v392_v5 = vmax.f32 %v386_v63, %v390_v2 }
 0x101   : > { %v393_v4 = vmax.f32 %v388_v1, %v391_v3 }
 0x103   : > { %534 = vmatprep.mubr.f32.mxu1 %v393_v4 }
 0x104   : > { %535 = vmatmul.mubr.f32.vlgmr.msra.gmra.mrb[0].mxu1 %v392_v5 }
 0x1d7   : > { %v536_v21 = vpop.f32.mrb[0].mxu1 }
 0x1d8   : > { %v537_v22 = vadd.f32 %v536_v21, %v463_v19  ;;  %v538_v24 = vpop.f32.mrb[1].mxu1 }
 0x1d9   : > { %v539_v25 = vadd.f32 %v538_v24, %v467_v20 }
 0x1da   : > { %v541_v26 = vmul.f32 0.1, %v537_v22 }
 0x1db   : > { %v542_v27 = vmul.f32 0.1, %v539_v25 }
 0x1dc   : > { %v543_v29 = vmax.f32 %v537_v22, %v541_v26 }
 0x1dd   : > { %v544_v28 = vmax.f32 %v539_v25, %v542_v27 }
 0x1df   : > { %648 = vmatprep.mubr.f32.mxu0 %v544_v28 }
 0x1e0   : > { %649 = vmatmul.mubr.f32.vlgmr.msra.gmra.mrb[2].mxu0 %v543_v29 }
 0x2b3   : > { %v751_v30 = vpop.f32.mrb[2].mxu0 }
 0x2b4   : > { %v752_v32 = vpop.f32.mrb[3].mxu0 }
 0x2b5   : > { %v753_v33 = vadd.f32 %v752_v32, %v751_v30 }
 0x2b7   : > { %v651_v34 = vadd.f32 %v753_v33, %v716_v31 }
 0x2b9   : > { %v654_v35 = vadd.f32 %v651_v34, %v1140_v23 }
 0x2bb   : > { %655 = vst [vmem:[%s273_s29] sm:$0xff] %v654_v35 }
 0x2bc PF: > { %s17_s24 = sadd.s32 1, %s897_s24  }
 0x2bd   : > { %p14_p4 = scmp.ge.s32.totalorder %s17_s24, 4  }
 0x2bf   :  { %16 = sbr.rel (!%p14_p4) target bundleno = 1 (0x1), region = 78 }

// kernel: additive_coupling_forward.1
= control target key start
LH: loop header
LB: loop body
LE: loop exit
PB: predicated region body
PF: predicated region fallthrough
CT: control target
= control target key end

     0   :  { %s940_s24 = smov 0   ;;  %s1371_s0 = inlined_call_operand.vmem [shape: f32[16,128], index: 0, kind: input, shape index: {}, may-alias: {0,7}]   ;;  %s1372_s1 = inlined_call_operand.vmem [shape: f32[128,256], index: 1, kind: input, shape index: {}]   ;;  %s1373_s2 = inlined_call_operand.vmem [shape: f32[1,256], index: 2, kind: input, shape index: {}]   ;;  %s1374_s3 = inlined_call_operand.vmem [shape: f32[256,256], index: 3, kind: input, shape index: {}]   ;;  %s1375_s4 = inlined_call_operand.vmem [shape: f32[1,256], index: 4, kind: input, shape index: {}]   ;;  %s1376_s5 = inlined_call_operand.vmem [shape: f32[256,128], index: 5, kind: input, shape index: {}]   ;;  %s1377_s6 = inlined_call_operand.vmem [shape: f32[1,128], index: 6, kind: input, shape index: {}]   ;;  %s1378_s7 = inlined_call_operand.vmem [shape: f32[16,128], index: 7, kind: output, shape index: {}, may-alias: {0,7}]  }
   0x1 LB: > { %s709_s25 = sadd.s32 4294967295, %s897_s24   ;;  %p713_p0 = scmp.ge.s32.totalorder %s897_s24, 1  ;;  %s897_s24 = sphi %s940_s24, %s17_s24  }
   0x2   : > { %p236_p1 = scmp.lt.s32.totalorder %s897_s24, 3 }
   0x4   : > { %p237_p2 = pnand %p713_p0, %p236_p1 }
   0x5   : > { %v276_v0 = vld [vmem:[%s1372_s1 + $0x8] sm:$0xff] (!%p237_p2)  ;;  %v278_v1 = vld [vmem:[%s1372_s1 + $0x18] sm:$0xff] (!%p237_p2)  ;;  %v275_v2 = vld [vmem:[%s1372_s1] sm:$0xff] (!%p237_p2)  ;;  %v899_v7 = vmov (!%p237_p2), 0.0   ;;  %p1070_p3 = scmp.lt.s32.totalorder (!%p237_p2), %s709_s25, 1 }
   0x6   : > { %240 = sbr.rel (%p237_p2) target bundleno = 700 (0x2bc), region = 48  ;;  %v754_v3 = vpack.c.bf16 (!%p237_p2), %v278_v1, %v276_v0  ;;  %v277_v4 = vld [vmem:[%s1372_s1 + $0x10] sm:$0xff] (!%p237_p2)  ;;  %v280_v5 = vld [vmem:[%s1372_s1 + $0x28] sm:$0xff] (!%p237_p2)  ;;  %v282_v6 = vld [vmem:[%s1372_s1 + $0x38] sm:$0xff] (!%p237_p2)  ;;  %383 = vmatprep.mubr.f32.mxu0 (!%p237_p2), %v899_v7 }
   0x7   : > { %v756_v8 = vpack.c.bf16 (!%p237_p2), %v277_v4, %v275_v2  ;;  %v758_v9 = vpack.c.bf16 (!%p237_p2), %v282_v6, %v280_v5  ;;  %v279_v10 = vld [vmem:[%s1372_s1 + $0x20] sm:$0xff] (!%p237_p2)  ;;  %v281_v11 = vld [vmem:[%s1372_s1 + $0x30] sm:$0xff] (!%p237_p2)  ;;  %v284_v12 = vld [vmem:[%s1372_s1 + $0x48] sm:$0xff] (!%p237_p2) }
   0x8   : > { %755 = vmatprep.subr.bf16.mxu0 (!%p237_p2), %v754_v3  ;;  %v286_v13 = vld [vmem:[%s1372_s1 + $0x58] sm:$0xff] (!%p237_p2)  ;;  %v760_v14 = vpack.c.bf16 (!%p237_p2), %v281_v11, %v279_v10  ;;  %v283_v16 = vld [vmem:[%s1372_s1 + $0x40] sm:$0xff] (!%p237_p2)  ;;  %v285_v17 = vld [vmem:[%s1372_s1 + $0x50] sm:$0xff] (!%p237_p2) }
   0x9   : > { %757 = vmatpush1.bf16.msra.mxu0 (!%p237_p2), %v756_v8  ;;  %v762_v15 = vpack.c.bf16 (!%p237_p2), %v286_v13, %v284_v12  ;;  %v288_v18 = vld [vmem:[%s1372_s1 + $0x68] sm:$0xff] (!%p237_p2)  ;;  %v290_v19 = vld [vmem:[%s1372_s1 + $0x78] sm:$0xff] (!%p237_p2)  ;;  %v764_v20 = vpack.c.bf16 (!%p237_p2), %v285_v17, %v283_v16  ;;  %v287_v22 = vld [vmem:[%s1372_s1 + $0x60] sm:$0xff] (!%p237_p2) }
   0xa   : > { %759 = vmatprep.subr.bf16.mxu0 (!%p237_p2), %v758_v9  ;;  %v766_v21 = vpack.c.bf16 (!%p237_p2), %v290_v19, %v288_v18  ;;  %v289_v23 = vld [vmem:[%s1372_s1 + $0x70] sm:$0xff] (!%p237_p2)  ;;  %v292_v24 = vld [vmem:[%s1372_s1 + $0x88] sm:$0xff] (!%p237_p2)  ;;  %v294_v25 = vld [vmem:[%s1372_s1 + $0x98] sm:$0xff] (!%p237_p2) }
   0xb   : > { %v291_v26 = vld [vmem:[%s1372_s1 + $0x80] sm:$0xff] (!%p237_p2)  ;;  %v293_v27 = vld [vmem:[%s1372_s1 + $0x90] sm:$0xff] (!%p237_p2)  ;;  %v395_v28 = vld [vmem:[%s1374_s3 + $0x8] sm:$0xff] (!%p237_p2)  ;;  %v768_v31 = vpack.c.bf16 (!%p237_p2), %v289_v23, %v287_v22  ;;  %v770_v36 = vpack.c.bf16 (!%p237_p2), %v294_v25, %v292_v24 }
   0xc   : > { %v397_v29 = vld [vmem:[%s1374_s3 + $0x18] sm:$0xff] (!%p237_p2)  ;;  %v394_v30 = vld [vmem:[%s1374_s3] sm:$0xff] (!%p237_p2)  ;;  %v396_v33 = vld [vmem:[%s1374_s3 + $0x10] sm:$0xff] (!%p237_p2)  ;;  %v772_v46 = vpack.c.bf16 (!%p237_p2), %v293_v27, %v291_v26 }
   0xd   : > { %761 = vmatpush1.bf16.msra.mxu0 %v760_v14  ;;  %v786_v32 = vpack.c.bf16 %v397_v29, %v395_v28  ;;  %v399_v34 = vld [vmem:[%s1374_s3 + $0x28] sm:$0xff]  ;;  %v401_v35 = vld [vmem:[%s1374_s3 + $0x38] sm:$0xff]  ;;  %v788_v37 = vpack.c.bf16 %v396_v33, %v394_v30  ;;  %v398_v39 = vld [vmem:[%s1374_s3 + $0x20] sm:$0xff]  ;;  %s1381_s25 = smov (!%p1070_p3, %s709_s25), 1 }
   0xe   : > { %763 = vmatprep.subr.bf16.mxu0 %v762_v15  ;;  %v790_v38 = vpack.c.bf16 %v401_v35, %v399_v34  ;;  %v400_v40 = vld [vmem:[%s1374_s3 + $0x30] sm:$0xff]  ;;  %v403_v41 = vld [vmem:[%s1374_s3 + $0x48] sm:$0xff]  ;;  %v298_v43 = vld [vmem:[%s1372_s1 + $0xb8] sm:$0xff]  ;;  %s714_s30 = sshll.u32 %s1381_s25, 3 }
   0xf   : > { %v296_v42 = vld [vmem:[%s1372_s1 + $0xa8] sm:$0xff]  ;;  %787 = vmatprep.subr.bf16.mxu1 %v786_v32  ;;  %v405_v44 = vld [vmem:[%s1374_s3 + $0x58] sm:$0xff]  ;;  %v792_v45 = vpack.c.bf16 %v400_v40, %v398_v39  ;;  %v295_v47 = vld [vmem:[%s1372_s1 + $0xa0] sm:$0xff]  ;;  %s269_s14 = scalar_lea.vmem %s1371_s0, %s714_s30  ;;  %s273_s29 = scalar_lea.vmem %s1378_s7, %s714_s30 }
  0x10   : > { %789 = vmatpush1.bf16.msra.mxu1 %v788_v37  ;;  %v794_v48 = vpack.c.bf16 %v405_v44, %v403_v41  ;;  %v402_v49 = vld [vmem:[%s1374_s3 + $0x40] sm:$0xff]  ;;  %v404_v50 = vld [vmem:[%s1374_s3 + $0x50] sm:$0xff]  ;;  %v774_v51 = vpack.c.bf16 %v298_v43, %v296_v42  ;;  %v407_v53 = vld [vmem:[%s1374_s3 + $0x68] sm:$0xff] }
  0x11   : > { %765 = vmatpush1.bf16.msra.mxu0 %v764_v20  ;;  %791 = vmatprep.subr.bf16.mxu1 %v790_v38  ;;  %v297_v52 = vld [vmem:[%s1372_s1 + $0xb0] sm:$0xff]  ;;  %v409_v54 = vld [vmem:[%s1374_s3 + $0x78] sm:$0xff]  ;;  %v300_v55 = vld [vmem:[%s1372_s1 + $0xc8] sm:$0xff]  ;;  %v796_v57 = vpack.c.bf16 %v404_v50, %v402_v49 }
  0x12   : > { %767 = vmatprep.subr.bf16.mxu0 %v766_v21  ;;  %v302_v56 = vld [vmem:[%s1372_s1 + $0xd8] sm:$0xff]  ;;  %v776_v58 = vpack.c.bf16 %v297_v52, %v295_v47  ;;  %v299_v59 = vld [vmem:[%s1372_s1 + $0xc0] sm:$0xff]  ;;  %v798_v60 = vpack.c.bf16 %v409_v54, %v407_v53  ;;  %v408_v62 = vld [vmem:[%s1374_s3 + $0x70] sm:$0xff] }
  0x13   : > { %v406_v61 = vld [vmem:[%s1374_s3 + $0x60] sm:$0xff]  ;;  %v778_v63 = vpack.c.bf16 %v302_v56, %v300_v55  ;;  %v301_v0 = vld [vmem:[%s1372_s1 + $0xd0] sm:$0xff]  ;;  %v411_v1 = vld [vmem:[%s1374_s3 + $0x88] sm:$0xff] }
  0x14   : > { %793 = vmatpush1.bf16.msra.mxu1 %v792_v45  ;;  %v413_v2 = vld [vmem:[%s1374_s3 + $0x98] sm:$0xff]  ;;  %v304_v3 = vld [vmem:[%s1372_s1 + $0xe8] sm:$0xff]  ;;  %v800_v5 = vpack.c.bf16 %v408_v62, %v406_v61  ;;  %v780_v6 = vpack.c.bf16 %v301_v0, %v299_v59  ;;  %v303_v7 = vld [vmem:[%s1372_s1 + $0xe0] sm:$0xff] }
  0x15   : > { %769 = vmatpush1.bf16.msra.mxu0 %v768_v31  ;;  %795 = vmatprep.subr.bf16.mxu1 %v794_v48  ;;  %v306_v4 = vld [vmem:[%s1372_s1 + $0xf8] sm:$0xff]  ;;  %v802_v8 = vpack.c.bf16 %v413_v2, %v411_v1  ;;  %v410_v9 = vld [vmem:[%s1374_s3 + $0x80] sm:$0xff]  ;;  %v412_v10 = vld [vmem:[%s1374_s3 + $0x90] sm:$0xff] }
  0x16   : > { %771 = vmatprep.subr.bf16.mxu0 %v770_v36  ;;  %v782_v11 = vpack.c.bf16 %v306_v4, %v304_v3  ;;  %v305_v12 = vld [vmem:[%s1372_s1 + $0xf0] sm:$0xff]  ;;  %v415_v13 = vld [vmem:[%s1374_s3 + $0xa8] sm:$0xff]  ;;  %v417_v14 = vld [vmem:[%s1374_s3 + $0xb8] sm:$0xff]  ;;  %v804_v15 = vpack.c.bf16 %v412_v10, %v410_v9 }
  0x17   : > { %v784_v16 = vpack.c.bf16 %v305_v12, %v303_v7  ;;  %v806_v17 = vpack.c.bf16 %v417_v14, %v415_v13  ;;  %v414_v18 = vld [vmem:[%s1374_s3 + $0xa0] sm:$0xff]  ;;  %v416_v19 = vld [vmem:[%s1374_s3 + $0xb0] sm:$0xff]  ;;  %v419_v20 = vld [vmem:[%s1374_s3 + $0xc8] sm:$0xff] }
  0x18   : > { %797 = vmatpush1.bf16.msra.mxu1 %v796_v57  ;;  %v421_v21 = vld [vmem:[%s1374_s3 + $0xd8] sm:$0xff]  ;;  %v808_v22 = vpack.c.bf16 %v416_v19, %v414_v18  ;;  %v1140_v23 = vld [vmem:[%s269_s14] sm:$0xff]  ;;  %v420_v26 = vld [vmem:[%s1374_s3 + $0xd0] sm:$0xff] }
  0x19   : > { %773 = vmatpush1.bf16.msra.mxu0 %v772_v46  ;;  %799 = vmatprep.subr.bf16.mxu1 %v798_v60  ;;  %v810_v24 = vpack.c.bf16 %v421_v21, %v419_v20  ;;  %v418_v25 = vld [vmem:[%s1374_s3 + $0xc0] sm:$0xff]  ;;  %v423_v27 = vld [vmem:[%s1374_s3 + $0xe8] sm:$0xff]  ;;  %v425_v28 = vld [vmem:[%s1374_s3 + $0xf8] sm:$0xff] }
  0x1a   : > { %775 = vmatprep.subr.bf16.mxu0 %v774_v51  ;;  %v812_v29 = vpack.c.bf16 %v420_v26, %v418_v25  ;;  %v814_v30 = vpack.c.bf16 %v425_v28, %v423_v27  ;;  %v422_v31 = vld [vmem:[%s1374_s3 + $0xe0] sm:$0xff]  ;;  %v424_v32 = vld [vmem:[%s1374_s3 + $0xf0] sm:$0xff]  ;;  %v427_v33 = vld [vmem:[%s1374_s3 + $0x108] sm:$0xff] }
  0x1b   : > { %v429_v34 = vld [vmem:[%s1374_s3 + $0x118] sm:$0xff]  ;;  %v816_v35 = vpack.c.bf16 %v424_v32, %v422_v31  ;;  %v426_v37 = vld [vmem:[%s1374_s3 + $0x100] sm:$0xff]  ;;  %v428_v38 = vld [vmem:[%s1374_s3 + $0x110] sm:$0xff] }
  0x1c   : > { %801 = vmatpush1.bf16.msra.mxu1 %v800_v5  ;;  %v818_v36 = vpack.c.bf16 %v429_v34, %v427_v33  ;;  %v431_v39 = vld [vmem:[%s1374_s3 + $0x128] sm:$0xff]  ;;  %v433_v40 = vld [vmem:[%s1374_s3 + $0x138] sm:$0xff]  ;;  %v820_v41 = vpack.c.bf16 %v428_v38, %v426_v37  ;;  %v430_v43 = vld [vmem:[%s1374_s3 + $0x120] sm:$0xff] }
  0x1d   : > { %777 = vmatpush1.bf16.msra.mxu0 %v776_v58  ;;  %803 = vmatprep.subr.bf16.mxu1 %v802_v8  ;;  %v822_v42 = vpack.c.bf16 %v433_v40, %v431_v39  ;;  %v432_v44 = vld [vmem:[%s1374_s3 + $0x130] sm:$0xff]  ;;  %v435_v45 = vld [vmem:[%s1374_s3 + $0x148] sm:$0xff]  ;;  %v437_v46 = vld [vmem:[%s1374_s3 + $0x158] sm:$0xff] }
  0x1e   : > { %779 = vmatprep.subr.bf16.mxu0 %v778_v63  ;;  %v824_v47 = vpack.c.bf16 %v432_v44, %v430_v43  ;;  %v826_v48 = vpack.c.bf16 %v437_v46, %v435_v45  ;;  %v434_v49 = vld [vmem:[%s1374_s3 + $0x140] sm:$0xff]  ;;  %v436_v50 = vld [vmem:[%s1374_s3 + $0x150] sm:$0xff]  ;;  %v439_v51 = vld [vmem:[%s1374_s3 + $0x168] sm:$0xff] }
  0x1f   : > { %v441_v52 = vld [vmem:[%s1374_s3 + $0x178] sm:$0xff]  ;;  %v828_v53 = vpack.c.bf16 %v436_v50, %v434_v49  ;;  %v438_v55 = vld [vmem:[%s1374_s3 + $0x160] sm:$0xff]  ;;  %v440_v56 = vld [vmem:[%s1374_s3 + $0x170] sm:$0xff] }
  0x20   : > { %805 = vmatpush1.bf16.msra.mxu1 %v804_v15  ;;  %v830_v54 = vpack.c.bf16 %v441_v52, %v439_v51  ;;  %v443_v57 = vld [vmem:[%s1374_s3 + $0x188] sm:$0xff]  ;;  %v445_v58 = vld [vmem:[%s1374_s3 + $0x198] sm:$0xff]  ;;  %v832_v59 = vpack.c.bf16 %v440_v56, %v438_v55  ;;  %v442_v61 = vld [vmem:[%s1374_s3 + $0x180] sm:$0xff]  ;;  %v309_v55 = vlaneseq }
  0x21   : > { %781 = vmatpush1.bf16.msra.mxu0 %v780_v6  ;;  %807 = vmatprep.subr.bf16.mxu1 %v806_v17  ;;  %v834_v60 = vpack.c.bf16 %v445_v58, %v443_v57  ;;  %v444_v62 = vld [vmem:[%s1374_s3 + $0x190] sm:$0xff]  ;;  %v447_v63 = vld [vmem:[%s1374_s3 + $0x1a8] sm:$0xff]  ;;  %v449_v0 = vld [vmem:[%s1374_s3 + $0x1b8] sm:$0xff] }
  0x22   : > { %783 = vmatprep.subr.bf16.mxu0 %v782_v11  ;;  %v836_v1 = vpack.c.bf16 %v444_v62, %v442_v61  ;;  %v838_v2 = vpack.c.bf16 %v449_v0, %v447_v63  ;;  %v446_v3 = vld [vmem:[%s1374_s3 + $0x1a0] sm:$0xff]  ;;  %v448_v4 = vld [vmem:[%s1374_s3 + $0x1b0] sm:$0xff]  ;;  %v451_v6 = vld [vmem:[%s1374_s3 + $0x1c8] sm:$0xff]  ;;  %v310_v56 = vshrl.u32 %v309_v55, 7 }
  0x23   : > { %v840_v5 = vpack.c.bf16 %v448_v4, %v446_v3  ;;  %v453_v7 = vld [vmem:[%s1374_s3 + $0x1d8] sm:$0xff]  ;;  %v450_v9 = vld [vmem:[%s1374_s3 + $0x1c0] sm:$0xff]  ;;  %v452_v10 = vld [vmem:[%s1374_s3 + $0x1d0] sm:$0xff] }
  0x24   : > { %809 = vmatpush1.bf16.msra.mxu1 %v808_v22  ;;  %v842_v8 = vpack.c.bf16 %v453_v7, %v451_v6  ;;  %v844_v11 = vpack.c.bf16 %v452_v10, %v450_v9  ;;  %v455_v12 = vld [vmem:[%s1374_s3 + $0x1e8] sm:$0xff]  ;;  %v457_v13 = vld [vmem:[%s1374_s3 + $0x1f8] sm:$0xff]  ;;  %v454_v15 = vld [vmem:[%s1374_s3 + $0x1e0] sm:$0xff]  ;;  %v311_v57 = vsub.s32 0, %v310_v56 }
  0x25   : > { %785 = vmatpush1.bf16.msra.mxu0 %v784_v16  ;;  %811 = vmatprep.subr.bf16.mxu1 %v810_v24  ;;  %v846_v14 = vpack.c.bf16 %v457_v13, %v455_v12  ;;  %v456_v16 = vld [vmem:[%s1374_s3 + $0x1f0] sm:$0xff]  ;;  %v561_v18 = vld [vmem:[%s1376_s5 + $0x80] sm:$0xff]  ;;  %v562_v19 = vld [vmem:[%s1376_s5 + $0x88] sm:$0xff] }
  0x26   : > { %v848_v17 = vpack.c.bf16 %v456_v16, %v454_v15  ;;  %v545_v20 = vld [vmem:[%s1376_s5] sm:$0xff]  ;;  %v850_v21 = vpack.c.bf16 %v562_v19, %v561_v18  ;;  %v546_v22 = vld [vmem:[%s1376_s5 + $0x8] sm:$0xff]  ;;  %v563_v24 = vld [vmem:[%s1376_s5 + $0x90] sm:$0xff] }
  0x27   : > { %v564_v25 = vld [vmem:[%s1376_s5 + $0x98] sm:$0xff]  ;;  %v852_v26 = vpack.c.bf16 %v546_v22, %v545_v20  ;;  %v547_v28 = vld [vmem:[%s1376_s5 + $0x10] sm:$0xff]  ;;  %v566_v31 = vld [vmem:[%s1376_s5 + $0xa8] sm:$0xff] }
  0x28   : > { %384 = vmatmul.mubr.f32.vlgmr.msra.gmra.mrb[0].mxu0 %v1140_v23  ;;  %813 = vmatpush1.bf16.msra.mxu1 %v812_v29  ;;  %v854_v27 = vpack.c.bf16 %v564_v25, %v563_v24  ;;  %v548_v29 = vld [vmem:[%s1376_s5 + $0x18] sm:$0xff]  ;;  %v549_v34 = vld [vmem:[%s1376_s5 + $0x20] sm:$0xff]  ;;  %v551_v40 = vld [vmem:[%s1376_s5 + $0x30] sm:$0xff] }
  0x29   : > { %815 = vmatprep.subr.bf16.mxu1 %v814_v30  ;;  %v565_v30 = vld [vmem:[%s1376_s5 + $0xa0] sm:$0xff]  ;;  %851 = vmatprep.subr.bf16.mxu0 %v850_v21  ;;  %v856_v32 = vpack.c.bf16 %v548_v29, %v547_v28  ;;  %v568_v37 = vld [vmem:[%s1376_s5 + $0xb8] sm:$0xff]  ;;  %v570_v43 = vld [vmem:[%s1376_s5 + $0xc8] sm:$0xff] }
  0x2a   : > { %853 = vmatpush3.bf16.msra.mxu0 %v852_v26  ;;  %v858_v33 = vpack.c.bf16 %v566_v31, %v565_v30  ;;  %v553_v46 = vld [vmem:[%s1376_s5 + $0x40] sm:$0xff]  ;;  %v572_v49 = vld [vmem:[%s1376_s5 + $0xd8] sm:$0xff]  ;;  %v555_v52 = vld [vmem:[%s1376_s5 + $0x50] sm:$0xff] }
  0x2b   : > { %855 = vmatprep.subr.bf16.mxu0 %v854_v27  ;;  %v307_v58 = vld [vmem:[%s1373_s2] sm:$0x3]  ;;  %v574_v7 = vld [vmem:[%s1376_s5 + $0xe8] sm:$0xff]  ;;  %v575_v12 = vld [vmem:[%s1376_s5 + $0xf0] sm:$0xff] }
  0x2c   : > { %817 = vmatpush1.bf16.msra.mxu1 %v816_v35  ;;  %v550_v35 = vld [vmem:[%s1376_s5 + $0x28] sm:$0xff]  ;;  %v573_v6 = vld [vmem:[%s1376_s5 + $0xe0] sm:$0xff]  ;;  %v576_v13 = vld [vmem:[%s1376_s5 + $0xf8] sm:$0xff] }
  0x2d   : > { %819 = vmatprep.subr.bf16.mxu1 %v818_v36  ;;  %v567_v36 = vld [vmem:[%s1376_s5 + $0xb0] sm:$0xff]  ;;  %v860_v38 = vpack.c.bf16 %v550_v35, %v549_v34  ;;  %v557_v9 = vld [vmem:[%s1376_s5 + $0x60] sm:$0xff]  ;;  %v558_v10 = vld [vmem:[%s1376_s5 + $0x68] sm:$0xff] }
  0x2e   : > { %857 = vmatpush3.bf16.msra.mxu0 %v856_v32  ;;  %v862_v39 = vpack.c.bf16 %v568_v37, %v567_v36  ;;  %v559_v15 = vld [vmem:[%s1376_s5 + $0x70] sm:$0xff]  ;;  %v560_v16 = vld [vmem:[%s1376_s5 + $0x78] sm:$0xff]  ;;  %v458_v18 = vld [vmem:[%s1375_s4] sm:$0x3] }
  0x2f   : > { %859 = vmatprep.subr.bf16.mxu0 %v858_v33  ;;  %v463_v19 = vrot.slane %v458_v18, %v311_v57  ;;  %v716_v31 = vld [vmem:[%s1377_s6] ss:$0 sm:$0xff] }
  0x30   : > { %821 = vmatpush1.bf16.msra.mxu1 %v820_v41  ;;  %v552_v41 = vld [vmem:[%s1376_s5 + $0x38] sm:$0xff] }
  0x31   : > { %823 = vmatprep.subr.bf16.mxu1 %v822_v42  ;;  %v569_v42 = vld [vmem:[%s1376_s5 + $0xc0] sm:$0xff]  ;;  %v864_v44 = vpack.c.bf16 %v552_v41, %v551_v40 }
  0x32   : > { %861 = vmatpush3.bf16.msra.mxu0 %v860_v38  ;;  %v866_v45 = vpack.c.bf16 %v570_v43, %v569_v42 }
  0x33   : > { %863 = vmatprep.subr.bf16.mxu0 %v862_v39 }
  0x34   : > { %825 = vmatpush1.bf16.msra.mxu1 %v824_v47  ;;  %v554_v47 = vld [vmem:[%s1376_s5 + $0x48] sm:$0xff] }
  0x35   : > { %827 = vmatprep.subr.bf16.mxu1 %v826_v48  ;;  %v571_v48 = vld [vmem:[%s1376_s5 + $0xd0] sm:$0xff]  ;;  %v868_v50 = vpack.c.bf16 %v554_v47, %v553_v46 }
  0x36   : > { %865 = vmatpush3.bf16.msra.mxu0 %v864_v44  ;;  %v870_v51 = vpack.c.bf16 %v572_v49, %v571_v48 }
  0x37   : > { %867 = vmatprep.subr.bf16.mxu0 %v866_v45 }
  0x38   : > { %829 = vmatpush1.bf16.msra.mxu1 %v828_v53  ;;  %v556_v53 = vld [vmem:[%s1376_s5 + $0x58] sm:$0xff] }
  0x39   : > { %831 = vmatprep.subr.bf16.mxu1 %v830_v54  ;;  %v872_v54 = vpack.c.bf16 %v556_v53, %v555_v52 }
  0x3a   : > { %869 = vmatpush3.bf16.msra.mxu0 %v868_v50 }
  0x3b   : > { %871 = vmatprep.subr.bf16.mxu0 %v870_v51 }
  0x3c   : > { %833 = vmatpush1.bf16.msra.mxu1 %v832_v59  ;;  %v315_v59 = vsub.s32 1, %v310_v56 }
  0x3d   : > { %835 = vmatprep.subr.bf16.mxu1 %v834_v60  ;;  %v312_v60 = vrot.slane %v307_v58, %v311_v57 }
  0x3e   : > { %873 = vmatpush3.bf16.msra.mxu0 %v872_v54  ;;  %v316_v61 = vrot.slane %v307_v58, %v315_v59  ;;  %v467_v20 = vrot.slane %v458_v18, %v315_v59 }
  0x40   : > { %837 = vmatpush1.bf16.msra.mxu1 %v836_v1 }
  0x41   : > { %839 = vmatprep.subr.bf16.mxu1 %v838_v2 }
  0x44   : > { %841 = vmatpush1.bf16.msra.mxu1 %v840_v5 }
  0x45   : > { %843 = vmatprep.subr.bf16.mxu1 %v842_v8  ;;  %v874_v8 = vpack.c.bf16 %v574_v7, %v573_v6 }
  0x47   : > { %875 = vmatprep.subr.bf16.mxu0 %v874_v8 }
  0x48   : > { %845 = vmatpush1.bf16.msra.mxu1 %v844_v11  ;;  %v876_v11 = vpack.c.bf16 %v558_v10, %v557_v9 }
  0x49   : > { %847 = vmatprep.subr.bf16.mxu1 %v846_v14  ;;  %v878_v14 = vpack.c.bf16 %v576_v13, %v575_v12 }
  0x4a   : > { %877 = vmatpush3.bf16.msra.mxu0 %v876_v11 }
  0x4b   : > { %879 = vmatprep.subr.bf16.mxu0 %v878_v14 }
  0x4c   : > { %849 = vmatpush1.bf16.msra.mxu1 %v848_v17  ;;  %v880_v17 = vpack.c.bf16 %v560_v16, %v559_v15 }
  0x4e   : > { %881 = vmatpush3.bf16.msra.mxu0 %v880_v17 }
  0xfb   : > { %v385_v62 = vpop.f32.mrb[0].mxu0 }
  0xfc   : > { %v386_v63 = vadd.f32 %v385_v62, %v312_v60  ;;  %v387_v0 = vpop.f32.mrb[1].mxu0 }
  0xfd   : > { %v388_v1 = vadd.f32 %v387_v0, %v316_v61 }
  0xfe   : > { %v390_v2 = vmul.f32 0.1, %v386_v63 }
  0xff   : > { %v391_v3 = vmul.f32 0.1, %v388_v1 }
 0x100   : > { %v392_v5 = vmax.f32 %v386_v63, %v390_v2 }
 0x101   : > { %v393_v4 = vmax.f32 %v388_v1, %v391_v3 }
 0x103   : > { %534 = vmatprep.mubr.f32.mxu1 %v393_v4 }
 0x104   : > { %535 = vmatmul.mubr.f32.vlgmr.msra.gmra.mrb[0].mxu1 %v392_v5 }
 0x1d7   : > { %v536_v21 = vpop.f32.mrb[0].mxu1 }
 0x1d8   : > { %v537_v22 = vadd.f32 %v536_v21, %v463_v19  ;;  %v538_v24 = vpop.f32.mrb[1].mxu1 }
 0x1d9   : > { %v539_v25 = vadd.f32 %v538_v24, %v467_v20 }
 0x1da   : > { %v541_v26 = vmul.f32 0.1, %v537_v22 }
 0x1db   : > { %v542_v27 = vmul.f32 0.1, %v539_v25 }
 0x1dc   : > { %v543_v29 = vmax.f32 %v537_v22, %v541_v26 }
 0x1dd   : > { %v544_v28 = vmax.f32 %v539_v25, %v542_v27 }
 0x1df   : > { %648 = vmatprep.mubr.f32.mxu0 %v544_v28 }
 0x1e0   : > { %649 = vmatmul.mubr.f32.vlgmr.msra.gmra.mrb[2].mxu0 %v543_v29 }
 0x2b3   : > { %v751_v30 = vpop.f32.mrb[2].mxu0 }
 0x2b4   : > { %v752_v32 = vpop.f32.mrb[3].mxu0 }
 0x2b5   : > { %v753_v33 = vadd.f32 %v752_v32, %v751_v30 }
 0x2b7   : > { %v651_v34 = vadd.f32 %v753_v33, %v716_v31 }
 0x2b9   : > { %v654_v35 = vadd.f32 %v651_v34, %v1140_v23 }
 0x2bb   : > { %655 = vst [vmem:[%s273_s29] sm:$0xff] %v654_v35 }
 0x2bc PF: > { %s17_s24 = sadd.s32 1, %s897_s24  }
 0x2bd   : > { %p14_p4 = scmp.ge.s32.totalorder %s17_s24, 4  }
 0x2bf   :  { %16 = sbr.rel (!%p14_p4) target bundleno = 1 (0x1), region = 78 }

// kernel: additive_coupling_forward.1
= control target key start
LH: loop header
LB: loop body
LE: loop exit
PB: predicated region body
PF: predicated region fallthrough
CT: control target
= control target key end

     0   :  { %s940_s24 = smov 0   ;;  %s1371_s0 = inlined_call_operand.vmem [shape: f32[16,128], index: 0, kind: input, shape index: {}]   ;;  %s1372_s1 = inlined_call_operand.vmem [shape: f32[128,256], index: 1, kind: input, shape index: {}]   ;;  %s1373_s2 = inlined_call_operand.vmem [shape: f32[1,256], index: 2, kind: input, shape index: {}]   ;;  %s1374_s3 = inlined_call_operand.vmem [shape: f32[256,256], index: 3, kind: input, shape index: {}]   ;;  %s1375_s4 = inlined_call_operand.vmem [shape: f32[1,256], index: 4, kind: input, shape index: {}]   ;;  %s1376_s5 = inlined_call_operand.vmem [shape: f32[256,128], index: 5, kind: input, shape index: {}]   ;;  %s1377_s6 = inlined_call_operand.vmem [shape: f32[1,128], index: 6, kind: input, shape index: {}]   ;;  %s1378_s7 = inlined_call_operand.vmem [shape: f32[16,128], index: 7, kind: output, shape index: {}]  }
   0x1 LB: > { %s709_s25 = sadd.s32 4294967295, %s897_s24   ;;  %p713_p0 = scmp.ge.s32.totalorder %s897_s24, 1  ;;  %s897_s24 = sphi %s940_s24, %s17_s24  }
   0x2   : > { %p236_p1 = scmp.lt.s32.totalorder %s897_s24, 3 }
   0x4   : > { %p237_p2 = pnand %p713_p0, %p236_p1 }
   0x5   : > { %v276_v0 = vld [vmem:[%s1372_s1 + $0x8] sm:$0xff] (!%p237_p2)  ;;  %v278_v1 = vld [vmem:[%s1372_s1 + $0x18] sm:$0xff] (!%p237_p2)  ;;  %v275_v2 = vld [vmem:[%s1372_s1] sm:$0xff] (!%p237_p2)  ;;  %v899_v7 = vmov (!%p237_p2), 0.0   ;;  %p1070_p3 = scmp.lt.s32.totalorder (!%p237_p2), %s709_s25, 1 }
   0x6   : > { %240 = sbr.rel (%p237_p2) target bundleno = 700 (0x2bc), region = 48  ;;  %v754_v3 = vpack.c.bf16 (!%p237_p2), %v278_v1, %v276_v0  ;;  %v277_v4 = vld [vmem:[%s1372_s1 + $0x10] sm:$0xff] (!%p237_p2)  ;;  %v280_v5 = vld [vmem:[%s1372_s1 + $0x28] sm:$0xff] (!%p237_p2)  ;;  %v282_v6 = vld [vmem:[%s1372_s1 + $0x38] sm:$0xff] (!%p237_p2)  ;;  %383 = vmatprep.mubr.f32.mxu0 (!%p237_p2), %v899_v7 }
   0x7   : > { %v756_v8 = vpack.c.bf16 (!%p237_p2), %v277_v4, %v275_v2  ;;  %v758_v9 = vpack.c.bf16 (!%p237_p2), %v282_v6, %v280_v5  ;;  %v279_v10 = vld [vmem:[%s1372_s1 + $0x20] sm:$0xff] (!%p237_p2)  ;;  %v281_v11 = vld [vmem:[%s1372_s1 + $0x30] sm:$0xff] (!%p237_p2)  ;;  %v284_v12 = vld [vmem:[%s1372_s1 + $0x48] sm:$0xff] (!%p237_p2) }
   0x8   : > { %755 = vmatprep.subr.bf16.mxu0 (!%p237_p2), %v754_v3  ;;  %v286_v13 = vld [vmem:[%s1372_s1 + $0x58] sm:$0xff] (!%p237_p2)  ;;  %v760_v14 = vpack.c.bf16 (!%p237_p2), %v281_v11, %v279_v10  ;;  %v283_v16 = vld [vmem:[%s1372_s1 + $0x40] sm:$0xff] (!%p237_p2)  ;;  %v285_v17 = vld [vmem:[%s1372_s1 + $0x50] sm:$0xff] (!%p237_p2) }
   0x9   : > { %757 = vmatpush1.bf16.msra.mxu0 (!%p237_p2), %v756_v8  ;;  %v762_v15 = vpack.c.bf16 (!%p237_p2), %v286_v13, %v284_v12  ;;  %v288_v18 = vld [vmem:[%s1372_s1 + $0x68] sm:$0xff] (!%p237_p2)  ;;  %v290_v19 = vld [vmem:[%s1372_s1 + $0x78] sm:$0xff] (!%p237_p2)  ;;  %v764_v20 = vpack.c.bf16 (!%p237_p2), %v285_v17, %v283_v16  ;;  %v287_v22 = vld [vmem:[%s1372_s1 + $0x60] sm:$0xff] (!%p237_p2) }
   0xa   : > { %759 = vmatprep.subr.bf16.mxu0 (!%p237_p2), %v758_v9  ;;  %v766_v21 = vpack.c.bf16 (!%p237_p2), %v290_v19, %v288_v18  ;;  %v289_v23 = vld [vmem:[%s1372_s1 + $0x70] sm:$0xff] (!%p237_p2)  ;;  %v292_v24 = vld [vmem:[%s1372_s1 + $0x88] sm:$0xff] (!%p237_p2)  ;;  %v294_v25 = vld [vmem:[%s1372_s1 + $0x98] sm:$0xff] (!%p237_p2) }
   0xb   : > { %v291_v26 = vld [vmem:[%s1372_s1 + $0x80] sm:$0xff] (!%p237_p2)  ;;  %v293_v27 = vld [vmem:[%s1372_s1 + $0x90] sm:$0xff] (!%p237_p2)  ;;  %v395_v28 = vld [vmem:[%s1374_s3 + $0x8] sm:$0xff] (!%p237_p2)  ;;  %v768_v31 = vpack.c.bf16 (!%p237_p2), %v289_v23, %v287_v22  ;;  %v770_v36 = vpack.c.bf16 (!%p237_p2), %v294_v25, %v292_v24 }
   0xc   : > { %v397_v29 = vld [vmem:[%s1374_s3 + $0x18] sm:$0xff] (!%p237_p2)  ;;  %v394_v30 = vld [vmem:[%s1374_s3] sm:$0xff] (!%p237_p2)  ;;  %v396_v33 = vld [vmem:[%s1374_s3 + $0x10] sm:$0xff] (!%p237_p2)  ;;  %v772_v46 = vpack.c.bf16 (!%p237_p2), %v293_v27, %v291_v26 }
   0xd   : > { %761 = vmatpush1.bf16.msra.mxu0 %v760_v14  ;;  %v786_v32 = vpack.c.bf16 %v397_v29, %v395_v28  ;;  %v399_v34 = vld [vmem:[%s1374_s3 + $0x28] sm:$0xff]  ;;  %v401_v35 = vld [vmem:[%s1374_s3 + $0x38] sm:$0xff]  ;;  %v788_v37 = vpack.c.bf16 %v396_v33, %v394_v30  ;;  %v398_v39 = vld [vmem:[%s1374_s3 + $0x20] sm:$0xff]  ;;  %s1381_s25 = smov (!%p1070_p3, %s709_s25), 1 }
   0xe   : > { %763 = vmatprep.subr.bf16.mxu0 %v762_v15  ;;  %v790_v38 = vpack.c.bf16 %v401_v35, %v399_v34  ;;  %v400_v40 = vld [vmem:[%s1374_s3 + $0x30] sm:$0xff]  ;;  %v403_v41 = vld [vmem:[%s1374_s3 + $0x48] sm:$0xff]  ;;  %v298_v43 = vld [vmem:[%s1372_s1 + $0xb8] sm:$0xff]  ;;  %s714_s30 = sshll.u32 %s1381_s25, 3 }
   0xf   : > { %v296_v42 = vld [vmem:[%s1372_s1 + $0xa8] sm:$0xff]  ;;  %787 = vmatprep.subr.bf16.mxu1 %v786_v32  ;;  %v405_v44 = vld [vmem:[%s1374_s3 + $0x58] sm:$0xff]  ;;  %v792_v45 = vpack.c.bf16 %v400_v40, %v398_v39  ;;  %v295_v47 = vld [vmem:[%s1372_s1 + $0xa0] sm:$0xff]  ;;  %s269_s14 = scalar_lea.vmem %s1371_s0, %s714_s30  ;;  %s273_s29 = scalar_lea.vmem %s1378_s7, %s714_s30 }
  0x10   : > { %789 = vmatpush1.bf16.msra.mxu1 %v788_v37  ;;  %v794_v48 = vpack.c.bf16 %v405_v44, %v403_v41  ;;  %v402_v49 = vld [vmem:[%s1374_s3 + $0x40] sm:$0xff]  ;;  %v404_v50 = vld [vmem:[%s1374_s3 + $0x50] sm:$0xff]  ;;  %v774_v51 = vpack.c.bf16 %v298_v43, %v296_v42  ;;  %v407_v53 = vld [vmem:[%s1374_s3 + $0x68] sm:$0xff] }
  0x11   : > { %765 = vmatpush1.bf16.msra.mxu0 %v764_v20  ;;  %791 = vmatprep.subr.bf16.mxu1 %v790_v38  ;;  %v297_v52 = vld [vmem:[%s1372_s1 + $0xb0] sm:$0xff]  ;;  %v409_v54 = vld [vmem:[%s1374_s3 + $0x78] sm:$0xff]  ;;  %v300_v55 = vld [vmem:[%s1372_s1 + $0xc8] sm:$0xff]  ;;  %v796_v57 = vpack.c.bf16 %v404_v50, %v402_v49 }
  0x12   : > { %767 = vmatprep.subr.bf16.mxu0 %v766_v21  ;;  %v302_v56 = vld [vmem:[%s1372_s1 + $0xd8] sm:$0xff]  ;;  %v776_v58 = vpack.c.bf16 %v297_v52, %v295_v47  ;;  %v299_v59 = vld [vmem:[%s1372_s1 + $0xc0] sm:$0xff]  ;;  %v798_v60 = vpack.c.bf16 %v409_v54, %v407_v53  ;;  %v408_v62 = vld [vmem:[%s1374_s3 + $0x70] sm:$0xff] }
  0x13   : > { %v406_v61 = vld [vmem:[%s1374_s3 + $0x60] sm:$0xff]  ;;  %v778_v63 = vpack.c.bf16 %v302_v56, %v300_v55  ;;  %v301_v0 = vld [vmem:[%s1372_s1 + $0xd0] sm:$0xff]  ;;  %v411_v1 = vld [vmem:[%s1374_s3 + $0x88] sm:$0xff] }
  0x14   : > { %793 = vmatpush1.bf16.msra.mxu1 %v792_v45  ;;  %v413_v2 = vld [vmem:[%s1374_s3 + $0x98] sm:$0xff]  ;;  %v304_v3 = vld [vmem:[%s1372_s1 + $0xe8] sm:$0xff]  ;;  %v800_v5 = vpack.c.bf16 %v408_v62, %v406_v61  ;;  %v780_v6 = vpack.c.bf16 %v301_v0, %v299_v59  ;;  %v303_v7 = vld [vmem:[%s1372_s1 + $0xe0] sm:$0xff] }
  0x15   : > { %769 = vmatpush1.bf16.msra.mxu0 %v768_v31  ;;  %795 = vmatprep.subr.bf16.mxu1 %v794_v48  ;;  %v306_v4 = vld [vmem:[%s1372_s1 + $0xf8] sm:$0xff]  ;;  %v802_v8 = vpack.c.bf16 %v413_v2, %v411_v1  ;;  %v410_v9 = vld [vmem:[%s1374_s3 + $0x80] sm:$0xff]  ;;  %v412_v10 = vld [vmem:[%s1374_s3 + $0x90] sm:$0xff] }
  0x16   : > { %771 = vmatprep.subr.bf16.mxu0 %v770_v36  ;;  %v782_v11 = vpack.c.bf16 %v306_v4, %v304_v3  ;;  %v305_v12 = vld [vmem:[%s1372_s1 + $0xf0] sm:$0xff]  ;;  %v415_v13 = vld [vmem:[%s1374_s3 + $0xa8] sm:$0xff]  ;;  %v417_v14 = vld [vmem:[%s1374_s3 + $0xb8] sm:$0xff]  ;;  %v804_v15 = vpack.c.bf16 %v412_v10, %v410_v9 }
  0x17   : > { %v784_v16 = vpack.c.bf16 %v305_v12, %v303_v7  ;;  %v806_v17 = vpack.c.bf16 %v417_v14, %v415_v13  ;;  %v414_v18 = vld [vmem:[%s1374_s3 + $0xa0] sm:$0xff]  ;;  %v416_v19 = vld [vmem:[%s1374_s3 + $0xb0] sm:$0xff]  ;;  %v419_v20 = vld [vmem:[%s1374_s3 + $0xc8] sm:$0xff] }
  0x18   : > { %797 = vmatpush1.bf16.msra.mxu1 %v796_v57  ;;  %v421_v21 = vld [vmem:[%s1374_s3 + $0xd8] sm:$0xff]  ;;  %v808_v22 = vpack.c.bf16 %v416_v19, %v414_v18  ;;  %v1140_v23 = vld [vmem:[%s269_s14] sm:$0xff]  ;;  %v420_v26 = vld [vmem:[%s1374_s3 + $0xd0] sm:$0xff] }
  0x19   : > { %773 = vmatpush1.bf16.msra.mxu0 %v772_v46  ;;  %799 = vmatprep.subr.bf16.mxu1 %v798_v60  ;;  %v810_v24 = vpack.c.bf16 %v421_v21, %v419_v20  ;;  %v418_v25 = vld [vmem:[%s1374_s3 + $0xc0] sm:$0xff]  ;;  %v423_v27 = vld [vmem:[%s1374_s3 + $0xe8] sm:$0xff]  ;;  %v425_v28 = vld [vmem:[%s1374_s3 + $0xf8] sm:$0xff] }
  0x1a   : > { %775 = vmatprep.subr.bf16.mxu0 %v774_v51  ;;  %v812_v29 = vpack.c.bf16 %v420_v26, %v418_v25  ;;  %v814_v30 = vpack.c.bf16 %v425_v28, %v423_v27  ;;  %v422_v31 = vld [vmem:[%s1374_s3 + $0xe0] sm:$0xff]  ;;  %v424_v32 = vld [vmem:[%s1374_s3 + $0xf0] sm:$0xff]  ;;  %v427_v33 = vld [vmem:[%s1374_s3 + $0x108] sm:$0xff] }
  0x1b   : > { %v429_v34 = vld [vmem:[%s1374_s3 + $0x118] sm:$0xff]  ;;  %v816_v35 = vpack.c.bf16 %v424_v32, %v422_v31  ;;  %v426_v37 = vld [vmem:[%s1374_s3 + $0x100] sm:$0xff]  ;;  %v428_v38 = vld [vmem:[%s1374_s3 + $0x110] sm:$0xff] }
  0x1c   : > { %801 = vmatpush1.bf16.msra.mxu1 %v800_v5  ;;  %v818_v36 = vpack.c.bf16 %v429_v34, %v427_v33  ;;  %v431_v39 = vld [vmem:[%s1374_s3 + $0x128] sm:$0xff]  ;;  %v433_v40 = vld [vmem:[%s1374_s3 + $0x138] sm:$0xff]  ;;  %v820_v41 = vpack.c.bf16 %v428_v38, %v426_v37  ;;  %v430_v43 = vld [vmem:[%s1374_s3 + $0x120] sm:$0xff] }
  0x1d   : > { %777 = vmatpush1.bf16.msra.mxu0 %v776_v58  ;;  %803 = vmatprep.subr.bf16.mxu1 %v802_v8  ;;  %v822_v42 = vpack.c.bf16 %v433_v40, %v431_v39  ;;  %v432_v44 = vld [vmem:[%s1374_s3 + $0x130] sm:$0xff]  ;;  %v435_v45 = vld [vmem:[%s1374_s3 + $0x148] sm:$0xff]  ;;  %v437_v46 = vld [vmem:[%s1374_s3 + $0x158] sm:$0xff] }
  0x1e   : > { %779 = vmatprep.subr.bf16.mxu0 %v778_v63  ;;  %v824_v47 = vpack.c.bf16 %v432_v44, %v430_v43  ;;  %v826_v48 = vpack.c.bf16 %v437_v46, %v435_v45  ;;  %v434_v49 = vld [vmem:[%s1374_s3 + $0x140] sm:$0xff]  ;;  %v436_v50 = vld [vmem:[%s1374_s3 + $0x150] sm:$0xff]  ;;  %v439_v51 = vld [vmem:[%s1374_s3 + $0x168] sm:$0xff] }
  0x1f   : > { %v441_v52 = vld [vmem:[%s1374_s3 + $0x178] sm:$0xff]  ;;  %v828_v53 = vpack.c.bf16 %v436_v50, %v434_v49  ;;  %v438_v55 = vld [vmem:[%s1374_s3 + $0x160] sm:$0xff]  ;;  %v440_v56 = vld [vmem:[%s1374_s3 + $0x170] sm:$0xff] }
  0x20   : > { %805 = vmatpush1.bf16.msra.mxu1 %v804_v15  ;;  %v830_v54 = vpack.c.bf16 %v441_v52, %v439_v51  ;;  %v443_v57 = vld [vmem:[%s1374_s3 + $0x188] sm:$0xff]  ;;  %v445_v58 = vld [vmem:[%s1374_s3 + $0x198] sm:$0xff]  ;;  %v832_v59 = vpack.c.bf16 %v440_v56, %v438_v55  ;;  %v442_v61 = vld [vmem:[%s1374_s3 + $0x180] sm:$0xff]  ;;  %v309_v55 = vlaneseq }
  0x21   : > { %781 = vmatpush1.bf16.msra.mxu0 %v780_v6  ;;  %807 = vmatprep.subr.bf16.mxu1 %v806_v17  ;;  %v834_v60 = vpack.c.bf16 %v445_v58, %v443_v57  ;;  %v444_v62 = vld [vmem:[%s1374_s3 + $0x190] sm:$0xff]  ;;  %v447_v63 = vld [vmem:[%s1374_s3 + $0x1a8] sm:$0xff]  ;;  %v449_v0 = vld [vmem:[%s1374_s3 + $0x1b8] sm:$0xff] }
  0x22   : > { %783 = vmatprep.subr.bf16.mxu0 %v782_v11  ;;  %v836_v1 = vpack.c.bf16 %v444_v62, %v442_v61  ;;  %v838_v2 = vpack.c.bf16 %v449_v0, %v447_v63  ;;  %v446_v3 = vld [vmem:[%s1374_s3 + $0x1a0] sm:$0xff]  ;;  %v448_v4 = vld [vmem:[%s1374_s3 + $0x1b0] sm:$0xff]  ;;  %v451_v6 = vld [vmem:[%s1374_s3 + $0x1c8] sm:$0xff]  ;;  %v310_v56 = vshrl.u32 %v309_v55, 7 }
  0x23   : > { %v840_v5 = vpack.c.bf16 %v448_v4, %v446_v3  ;;  %v453_v7 = vld [vmem:[%s1374_s3 + $0x1d8] sm:$0xff]  ;;  %v450_v9 = vld [vmem:[%s1374_s3 + $0x1c0] sm:$0xff]  ;;  %v452_v10 = vld [vmem:[%s1374_s3 + $0x1d0] sm:$0xff] }
  0x24   : > { %809 = vmatpush1.bf16.msra.mxu1 %v808_v22  ;;  %v842_v8 = vpack.c.bf16 %v453_v7, %v451_v6  ;;  %v844_v11 = vpack.c.bf16 %v452_v10, %v450_v9  ;;  %v455_v12 = vld [vmem:[%s1374_s3 + $0x1e8] sm:$0xff]  ;;  %v457_v13 = vld [vmem:[%s1374_s3 + $0x1f8] sm:$0xff]  ;;  %v454_v15 = vld [vmem:[%s1374_s3 + $0x1e0] sm:$0xff]  ;;  %v311_v57 = vsub.s32 0, %v310_v56 }
  0x25   : > { %785 = vmatpush1.bf16.msra.mxu0 %v784_v16  ;;  %811 = vmatprep.subr.bf16.mxu1 %v810_v24  ;;  %v846_v14 = vpack.c.bf16 %v457_v13, %v455_v12  ;;  %v456_v16 = vld [vmem:[%s1374_s3 + $0x1f0] sm:$0xff]  ;;  %v561_v18 = vld [vmem:[%s1376_s5 + $0x80] sm:$0xff]  ;;  %v562_v19 = vld [vmem:[%s1376_s5 + $0x88] sm:$0xff] }
  0x26   : > { %v848_v17 = vpack.c.bf16 %v456_v16, %v454_v15  ;;  %v545_v20 = vld [vmem:[%s1376_s5] sm:$0xff]  ;;  %v850_v21 = vpack.c.bf16 %v562_v19, %v561_v18  ;;  %v546_v22 = vld [vmem:[%s1376_s5 + $0x8] sm:$0xff]  ;;  %v563_v24 = vld [vmem:[%s1376_s5 + $0x90] sm:$0xff] }
  0x27   : > { %v564_v25 = vld [vmem:[%s1376_s5 + $0x98] sm:$0xff]  ;;  %v852_v26 = vpack.c.bf16 %v546_v22, %v545_v20  ;;  %v547_v28 = vld [vmem:[%s1376_s5 + $0x10] sm:$0xff]  ;;  %v566_v31 = vld [vmem:[%s1376_s5 + $0xa8] sm:$0xff] }
  0x28   : > { %384 = vmatmul.mubr.f32.vlgmr.msra.gmra.mrb[0].mxu0 %v1140_v23  ;;  %813 = vmatpush1.bf16.msra.mxu1 %v812_v29  ;;  %v854_v27 = vpack.c.bf16 %v564_v25, %v563_v24  ;;  %v548_v29 = vld [vmem:[%s1376_s5 + $0x18] sm:$0xff]  ;;  %v549_v34 = vld [vmem:[%s1376_s5 + $0x20] sm:$0xff]  ;;  %v551_v40 = vld [vmem:[%s1376_s5 + $0x30] sm:$0xff] }
  0x29   : > { %815 = vmatprep.subr.bf16.mxu1 %v814_v30  ;;  %v565_v30 = vld [vmem:[%s1376_s5 + $0xa0] sm:$0xff]  ;;  %851 = vmatprep.subr.bf16.mxu0 %v850_v21  ;;  %v856_v32 = vpack.c.bf16 %v548_v29, %v547_v28  ;;  %v568_v37 = vld [vmem:[%s1376_s5 + $0xb8] sm:$0xff]  ;;  %v570_v43 = vld [vmem:[%s1376_s5 + $0xc8] sm:$0xff] }
  0x2a   : > { %853 = vmatpush3.bf16.msra.mxu0 %v852_v26  ;;  %v858_v33 = vpack.c.bf16 %v566_v31, %v565_v30  ;;  %v553_v46 = vld [vmem:[%s1376_s5 + $0x40] sm:$0xff]  ;;  %v572_v49 = vld [vmem:[%s1376_s5 + $0xd8] sm:$0xff]  ;;  %v555_v52 = vld [vmem:[%s1376_s5 + $0x50] sm:$0xff] }
  0x2b   : > { %855 = vmatprep.subr.bf16.mxu0 %v854_v27  ;;  %v307_v58 = vld [vmem:[%s1373_s2] sm:$0x3]  ;;  %v574_v7 = vld [vmem:[%s1376_s5 + $0xe8] sm:$0xff]  ;;  %v575_v12 = vld [vmem:[%s1376_s5 + $0xf0] sm:$0xff] }
  0x2c   : > { %817 = vmatpush1.bf16.msra.mxu1 %v816_v35  ;;  %v550_v35 = vld [vmem:[%s1376_s5 + $0x28] sm:$0xff]  ;;  %v573_v6 = vld [vmem:[%s1376_s5 + $0xe0] sm:$0xff]  ;;  %v576_v13 = vld [vmem:[%s1376_s5 + $0xf8] sm:$0xff] }
  0x2d   : > { %819 = vmatprep.subr.bf16.mxu1 %v818_v36  ;;  %v567_v36 = vld [vmem:[%s1376_s5 + $0xb0] sm:$0xff]  ;;  %v860_v38 = vpack.c.bf16 %v550_v35, %v549_v34  ;;  %v557_v9 = vld [vmem:[%s1376_s5 + $0x60] sm:$0xff]  ;;  %v558_v10 = vld [vmem:[%s1376_s5 + $0x68] sm:$0xff] }
  0x2e   : > { %857 = vmatpush3.bf16.msra.mxu0 %v856_v32  ;;  %v862_v39 = vpack.c.bf16 %v568_v37, %v567_v36  ;;  %v559_v15 = vld [vmem:[%s1376_s5 + $0x70] sm:$0xff]  ;;  %v560_v16 = vld [vmem:[%s1376_s5 + $0x78] sm:$0xff]  ;;  %v458_v18 = vld [vmem:[%s1375_s4] sm:$0x3] }
  0x2f   : > { %859 = vmatprep.subr.bf16.mxu0 %v858_v33  ;;  %v463_v19 = vrot.slane %v458_v18, %v311_v57  ;;  %v716_v31 = vld [vmem:[%s1377_s6] ss:$0 sm:$0xff] }
  0x30   : > { %821 = vmatpush1.bf16.msra.mxu1 %v820_v41  ;;  %v552_v41 = vld [vmem:[%s1376_s5 + $0x38] sm:$0xff] }
  0x31   : > { %823 = vmatprep.subr.bf16.mxu1 %v822_v42  ;;  %v569_v42 = vld [vmem:[%s1376_s5 + $0xc0] sm:$0xff]  ;;  %v864_v44 = vpack.c.bf16 %v552_v41, %v551_v40 }
  0x32   : > { %861 = vmatpush3.bf16.msra.mxu0 %v860_v38  ;;  %v866_v45 = vpack.c.bf16 %v570_v43, %v569_v42 }
  0x33   : > { %863 = vmatprep.subr.bf16.mxu0 %v862_v39 }
  0x34   : > { %825 = vmatpush1.bf16.msra.mxu1 %v824_v47  ;;  %v554_v47 = vld [vmem:[%s1376_s5 + $0x48] sm:$0xff] }
  0x35   : > { %827 = vmatprep.subr.bf16.mxu1 %v826_v48  ;;  %v571_v48 = vld [vmem:[%s1376_s5 + $0xd0] sm:$0xff]  ;;  %v868_v50 = vpack.c.bf16 %v554_v47, %v553_v46 }
  0x36   : > { %865 = vmatpush3.bf16.msra.mxu0 %v864_v44  ;;  %v870_v51 = vpack.c.bf16 %v572_v49, %v571_v48 }
  0x37   : > { %867 = vmatprep.subr.bf16.mxu0 %v866_v45 }
  0x38   : > { %829 = vmatpush1.bf16.msra.mxu1 %v828_v53  ;;  %v556_v53 = vld [vmem:[%s1376_s5 + $0x58] sm:$0xff] }
  0x39   : > { %831 = vmatprep.subr.bf16.mxu1 %v830_v54  ;;  %v872_v54 = vpack.c.bf16 %v556_v53, %v555_v52 }
  0x3a   : > { %869 = vmatpush3.bf16.msra.mxu0 %v868_v50 }
  0x3b   : > { %871 = vmatprep.subr.bf16.mxu0 %v870_v51 }
  0x3c   : > { %833 = vmatpush1.bf16.msra.mxu1 %v832_v59  ;;  %v315_v59 = vsub.s32 1, %v310_v56 }
  0x3d   : > { %835 = vmatprep.subr.bf16.mxu1 %v834_v60  ;;  %v312_v60 = vrot.slane %v307_v58, %v311_v57 }
  0x3e   : > { %873 = vmatpush3.bf16.msra.mxu0 %v872_v54  ;;  %v316_v61 = vrot.slane %v307_v58, %v315_v59  ;;  %v467_v20 = vrot.slane %v458_v18, %v315_v59 }
  0x40   : > { %837 = vmatpush1.bf16.msra.mxu1 %v836_v1 }
  0x41   : > { %839 = vmatprep.subr.bf16.mxu1 %v838_v2 }
  0x44   : > { %841 = vmatpush1.bf16.msra.mxu1 %v840_v5 }
  0x45   : > { %843 = vmatprep.subr.bf16.mxu1 %v842_v8  ;;  %v874_v8 = vpack.c.bf16 %v574_v7, %v573_v6 }
  0x47   : > { %875 = vmatprep.subr.bf16.mxu0 %v874_v8 }
  0x48   : > { %845 = vmatpush1.bf16.msra.mxu1 %v844_v11  ;;  %v876_v11 = vpack.c.bf16 %v558_v10, %v557_v9 }
  0x49   : > { %847 = vmatprep.subr.bf16.mxu1 %v846_v14  ;;  %v878_v14 = vpack.c.bf16 %v576_v13, %v575_v12 }
  0x4a   : > { %877 = vmatpush3.bf16.msra.mxu0 %v876_v11 }
  0x4b   : > { %879 = vmatprep.subr.bf16.mxu0 %v878_v14 }
  0x4c   : > { %849 = vmatpush1.bf16.msra.mxu1 %v848_v17  ;;  %v880_v17 = vpack.c.bf16 %v560_v16, %v559_v15 }
  0x4e   : > { %881 = vmatpush3.bf16.msra.mxu0 %v880_v17 }
  0xfb   : > { %v385_v62 = vpop.f32.mrb[0].mxu0 }
  0xfc   : > { %v386_v63 = vadd.f32 %v385_v62, %v312_v60  ;;  %v387_v0 = vpop.f32.mrb[1].mxu0 }
  0xfd   : > { %v388_v1 = vadd.f32 %v387_v0, %v316_v61 }
  0xfe   : > { %v390_v2 = vmul.f32 0.1, %v386_v63 }
  0xff   : > { %v391_v3 = vmul.f32 0.1, %v388_v1 }
 0x100   : > { %v392_v5 = vmax.f32 %v386_v63, %v390_v2 }
 0x101   : > { %v393_v4 = vmax.f32 %v388_v1, %v391_v3 }
 0x103   : > { %534 = vmatprep.mubr.f32.mxu1 %v393_v4 }
 0x104   : > { %535 = vmatmul.mubr.f32.vlgmr.msra.gmra.mrb[0].mxu1 %v392_v5 }
 0x1d7   : > { %v536_v21 = vpop.f32.mrb[0].mxu1 }
 0x1d8   : > { %v537_v22 = vadd.f32 %v536_v21, %v463_v19  ;;  %v538_v24 = vpop.f32.mrb[1].mxu1 }
 0x1d9   : > { %v539_v25 = vadd.f32 %v538_v24, %v467_v20 }
 0x1da   : > { %v541_v26 = vmul.f32 0.1, %v537_v22 }
 0x1db   : > { %v542_v27 = vmul.f32 0.1, %v539_v25 }
 0x1dc   : > { %v543_v29 = vmax.f32 %v537_v22, %v541_v26 }
 0x1dd   : > { %v544_v28 = vmax.f32 %v539_v25, %v542_v27 }
 0x1df   : > { %648 = vmatprep.mubr.f32.mxu0 %v544_v28 }
 0x1e0   : > { %649 = vmatmul.mubr.f32.vlgmr.msra.gmra.mrb[2].mxu0 %v543_v29 }
 0x2b3   : > { %v751_v30 = vpop.f32.mrb[2].mxu0 }
 0x2b4   : > { %v752_v32 = vpop.f32.mrb[3].mxu0 }
 0x2b5   : > { %v753_v33 = vadd.f32 %v752_v32, %v751_v30 }
 0x2b7   : > { %v651_v34 = vadd.f32 %v753_v33, %v716_v31 }
 0x2b9   : > { %v654_v35 = vadd.f32 %v651_v34, %v1140_v23 }
 0x2bb   : > { %655 = vst [vmem:[%s273_s29] sm:$0xff] %v654_v35 }
 0x2bc PF: > { %s17_s24 = sadd.s32 1, %s897_s24  }
 0x2bd   : > { %p14_p4 = scmp.ge.s32.totalorder %s17_s24, 4  }
 0x2bf   :  { %16 = sbr.rel (!%p14_p4) target bundleno = 1 (0x1), region = 78 }

</bundles_post_ra>
